<compile_context>
chip_gen: v5e
topology: v5e:2x2
jax: 0.10.0
libtpu: 0.0.40
codegen_flags: <defaults>
</compile_context>

<pallas_src>
import numpy as np
import jax
import jax.numpy as jnp
from jax.experimental import pallas as pl
from jax.experimental.pallas import tpu as pltpu

# ---- cell configuration (blocks*C must equal 24 to match conv_end(24->32)) ----
STEPS = 3                                        # blocks (= multiplier)
C = 8                                            # per-state channels -> concat = 24
NUM_EDGES = sum(2 + i for i in range(STEPS))     # 2 + 3 + 4 = 9
PRIMITIVES = ["none", "skip_connect", "conv_1x1"]
NUM_PRIMS = len(PRIMITIVES)
C_CAT = STEPS * C                                # 24
C_OUT = 32                                       # conv_end output channels
EMPTY_H1 = False


def _round_up(x, m):
    return ((x + m - 1) // m) * m


def _choose_tile(S, ts_target):
    """Pick (tile, S_pad): tile is a multiple of 128 that divides S_pad,
    S_pad >= S is a multiple of 128 with minimal padding in the common case."""
    S_128 = _round_up(S, 128)
    ts_target = max(128, (int(ts_target) // 128) * 128)
    if S_128 <= ts_target:                 # one step per sample
        return S_128, S_128
    M = S_128 // 128
    cap = ts_target // 128
    best = 1
    for d in range(1, cap + 1):
        if M % d == 0:
            best = d
    tile = 128 * best
    if tile * 4 >= ts_target:              # good divisor -> only 128-pad (often none)
        return tile, S_128
    # TODO(synk): poor divisor (e.g. prime S/128): fall back to padding S up to a
    # multiple of ts_target (costs one extra input copy via jnp.pad).
    return ts_target, _round_up(S, ts_target)


# --------------------------------------------------------------------------- #
# Kernel: one streaming FMA tile.
#   w0_ref, w1_ref : (C_OUT, C)   folded cell+conv_end+BN-scale matrices (f32)
#   shift_ref      : (C_OUT, 1)   folded BN shift (f32)
#   s0_ref, s1_ref : (C, ts)      channels-on-sublane input tiles (native dtype)
#   out_ref        : (C_OUT, ts)  lane-dense output tile (out_dtype)
# --------------------------------------------------------------------------- #
def _cell_kernel(w0_ref, w1_ref, shift_ref, s0_ref, s1_ref, out_ref):
    y = jnp.dot(w0_ref[...], s0_ref[...].astype(jnp.float32),
                preferred_element_type=jnp.float32)
    y = y + jnp.dot(w1_ref[...], s1_ref[...].astype(jnp.float32),
                    preferred_element_type=jnp.float32)
    y = y + shift_ref[...]                      # BN (eval) shift; scale already folded
    y = jnp.maximum(y, 0.2 * y)                 # LeakyReLU(0.2)
    out_ref[...] = y.astype(out_ref.dtype)


def cell_spe_forward(s0, s1, alphas, wconv, wend, bn_gamma, bn_beta,
                     bn_mean, bn_var, eps=1e-5, ts=16384,
                     out_dtype=None, empty_h1=EMPTY_H1):
    """s0, s1: (N, C, D, H, W).  alphas: (NUM_EDGES, NUM_PRIMS).

    Inputs stream in their native dtype; output dtype defaults to the input
    dtype (pass out_dtype=jnp.bfloat16 to halve output-stream traffic)."""
    N, Cc, D, H, W = s0.shape
    assert Cc == C and s1.shape == s0.shape
    S = D * H * W
    f32 = jnp.float32
    out_dtype = s0.dtype if out_dtype is None else jnp.dtype(out_dtype)

    # ---------- fold the fully-linear cell into W0, W1 (C_OUT, C) + shift -----
    eye = jnp.eye(C, dtype=f32)
    # per-edge effective matrix:  alpha_skip * I + alpha_conv * W_edge   (8x8)
    w_eff = (alphas[:, 1].astype(f32)[:, None, None] * eye[None]
             + alphas[:, 2].astype(f32)[:, None, None] * wconv.astype(f32))
    # track each state as  state = s0 @ A + s1 @ B   (row convention)
    A = [jnp.zeros((C, C), f32), eye]            # states = [s1, s0]
    B = [eye, jnp.zeros((C, C), f32)]
    offset = 0
    for _ in range(STEPS):
        An = jnp.zeros((C, C), f32)
        Bn = jnp.zeros((C, C), f32)
        for j in range(len(A)):
            if empty_h1 and j == 0:
                continue
            An = An + A[j] @ w_eff[offset + j]
            Bn = Bn + B[j] @ w_eff[offset + j]
        offset += len(A)
        A.append(An)
        B.append(Bn)
    A_cat = jnp.concatenate(A[-STEPS:], axis=1)                  # (C, C_CAT)
    B_cat = jnp.concatenate(B[-STEPS:], axis=1)
    wend_mat = wend.reshape(C_OUT, C_CAT).T.astype(f32)          # (C_CAT, C_OUT)
    scale = bn_gamma.astype(f32) / jnp.sqrt(bn_var.astype(f32) + eps)   # (C_OUT,)
    shift = bn_beta.astype(f32) - bn_mean.astype(f32) * scale           # (C_OUT,)
    W0 = ((A_cat @ wend_mat) * scale[None, :]).T                 # (C_OUT, C) acts on s0
    W1 = ((B_cat @ wend_mat) * scale[None, :]).T                 # (C_OUT, C) acts on s1
    shift_col = shift.reshape(C_OUT, 1)                          # stays f32
    # (weights/shift stay f32: resident in VMEM, zero bandwidth, free accuracy)

    # ---------- channels-on-sublane layout, no transposes: (N, C, S) ----------
    s0r = s0.reshape(N, C, S)
    s1r = s1.reshape(N, C, S)

    ts_target = max(128, min(int(ts), 1 << 20))
    if N == 1 and S >= 256:
        # v7x megacore: with batch 1, split the spatial axis so both TCs get work.
        ts_target = min(ts_target, max(128, ((_round_up(S, 128) // 2) // 128) * 128))
    tile, S_pad = _choose_tile(S, ts_target)

    if S_pad != S:
        # Minimal padding to the next multiple of 128 in the common case.
        # TODO(synk): this still materializes one extra copy of the inputs when
        #             S is not already 128-aligned.
        pad = ((0, 0), (0, 0), (0, S_pad - S))
        s0r = jnp.pad(s0r, pad)
        s1r = jnp.pad(s1r, pad)

    grid = (N, S_pad // tile)

    in_item = jnp.dtype(s0r.dtype).itemsize
    out_item = jnp.dtype(out_dtype).itemsize
    flops = 2 * 2 * C_OUT * C * N * S_pad
    bytes_accessed = (2 * N * C * S_pad * in_item            # s0 + s1 streams
                      + N * C_OUT * S_pad * out_item         # output stream
                      + (2 * C_OUT * C + C_OUT) * 4)         # resident weights
    cost = pl.CostEstimate(flops=int(flops), transcendentals=0,
                           bytes_accessed=int(bytes_accessed))

    # Double-buffered per-step VMEM footprint; only raise the scoped limit if needed.
    step_bytes = tile * (2 * C * in_item + C_OUT * out_item)
    vmem_needed = 2 * step_bytes + 64 * 1024
    cparams = dict(dimension_semantics=("parallel", "parallel"))
    if vmem_needed > 12 * 1024 * 1024:
        cparams["vmem_limit_bytes"] = min(int(vmem_needed * 2), 100 * 1024 * 1024)

    out = pl.pallas_call(
        _cell_kernel,
        out_shape=jax.ShapeDtypeStruct((N, C_OUT, S_pad), out_dtype),
        grid=grid,
        in_specs=[
            pl.BlockSpec((C_OUT, C), lambda n, t: (0, 0)),            # W0 (resident)
            pl.BlockSpec((C_OUT, C), lambda n, t: (0, 0)),            # W1 (resident)
            pl.BlockSpec((C_OUT, 1), lambda n, t: (0, 0)),            # shift (resident)
            pl.BlockSpec((None, C, tile), lambda n, t: (n, 0, t)),    # s0 tile
            pl.BlockSpec((None, C, tile), lambda n, t: (n, 0, t)),    # s1 tile
        ],
        out_specs=pl.BlockSpec((None, C_OUT, tile), lambda n, t: (n, 0, t)),
        compiler_params=pltpu.CompilerParams(**cparams),
        cost_estimate=cost,
    )(W0, W1, shift_col, s0r, s1r)

    if S_pad != S:
        out = out[:, :, :S]
    return out.reshape(N, C_OUT, D, H, W)


def cell_spe_reference(s0, s1, alphas, wconv, wend, bn_gamma, bn_beta,
                       bn_mean, bn_var, eps=1e-5, empty_h1=EMPTY_H1):
    """Pure-JAX reference mirroring the PyTorch forward structure (same math)."""
    N, Cc, D, H, W = s0.shape
    to_rows = lambda x: jnp.transpose(x, (0, 2, 3, 4, 1)).reshape(-1, C)
    s0r, s1r = to_rows(s0.astype(jnp.float32)), to_rows(s1.astype(jnp.float32))

    def mixed(x, e):
        # OPS placeholder: none (=0) / skip_connect (=x) / conv_1x1 (= x @ W_e)
        return alphas[e, 1] * x + alphas[e, 2] * (x @ wconv[e])

    states = [s1r, s0r]
    offset = 0
    for _ in range(STEPS):
        s = None
        for j, h in enumerate(states):
            if empty_h1 and j == 0:
                continue
            c = mixed(h, offset + j)
            s = c if s is None else s + c
        offset += len(states)
        states.append(s)
    cat = jnp.concatenate(states[-STEPS:], axis=-1)
    wend_mat = wend.reshape(C_OUT, C_CAT).T
    y = cat @ wend_mat
    scale = bn_gamma / jnp.sqrt(bn_var + eps)
    y = y * scale + (bn_beta - bn_mean * scale)
    y = jnp.where(y >= 0, y, 0.2 * y)
    out = y.reshape(N, D, H, W, C_OUT)
    return jnp.transpose(out, (0, 4, 1, 2, 3))


if __name__ == "__main__":
    key = jax.random.PRNGKey(0)
    k = jax.random.split(key, 12)

    N, D, H, W = 2, 8, 16, 32          # S = D*H*W = 4096 per sample (128-aligned)
    s0 = jax.random.normal(k[0], (N, C, D, H, W), jnp.float32)
    s1 = jax.random.normal(k[1], (N, C, D, H, W), jnp.float32)

    # Architecture weights: softmax over primitives per edge (deterministic).
    alphas = jax.nn.softmax(
        jax.random.normal(k[2], (NUM_EDGES, NUM_PRIMS), jnp.float32), axis=-1)

    # Per-edge pointwise conv weights for the 'conv_1x1' primitive.
    wconv = 0.1 * jax.random.normal(k[3], (NUM_EDGES, C, C), jnp.float32)

    # conv_end: Conv3d(24, 32, 1, bias=False) + BatchNorm3d(32) + LeakyReLU(0.2)
    wend = 0.1 * jax.random.normal(k[4], (C_OUT, C_CAT, 1, 1, 1), jnp.float32)
    bn_gamma = 1.0 + 0.1 * jax.random.normal(k[5], (C_OUT,), jnp.float32)
    bn_beta = 0.1 * jax.random.normal(k[6], (C_OUT,), jnp.float32)
    bn_mean = 0.05 * jax.random.normal(k[7], (C_OUT,), jnp.float32)
    bn_var = 0.5 + jnp.abs(jax.random.normal(k[8], (C_OUT,), jnp.float32))

    ref = cell_spe_reference(s0, s1, alphas, wconv, wend,
                             bn_gamma, bn_beta, bn_mean, bn_var)

    # f32 streaming path (native dtypes in, f32 out): tight tolerance.
    out_f32 = cell_spe_forward(s0, s1, alphas, wconv, wend,
                               bn_gamma, bn_beta, bn_mean, bn_var)
    out_f32 = jax.block_until_ready(out_f32)
    np.testing.assert_allclose(np.asarray(out_f32), np.asarray(ref),
                               rtol=1e-3, atol=1e-3)
    assert out_f32.shape == (N, C_OUT, D, H, W)

    # bf16 OUTPUT path (f32 inputs streamed as-is, bf16 stores): loose check.
    out_bf16 = cell_spe_forward(s0, s1, alphas, wconv, wend,
                                bn_gamma, bn_beta, bn_mean, bn_var,
                                out_dtype=jnp.bfloat16)
    out_bf16 = jax.block_until_ready(out_bf16)
    assert out_bf16.dtype == jnp.bfloat16
    np.testing.assert_allclose(np.asarray(out_bf16).astype(np.float32),
                               np.asarray(ref), rtol=5e-2, atol=5e-2)

    # Ragged spatial size (S not a multiple of 128): minimal 128-pad path, N=1.
    D2, H2, W2 = 3, 7, 5               # S = 105 -> padded to 128 inside the wrapper
    s0b = jax.random.normal(k[9], (1, C, D2, H2, W2), jnp.float32)
    s1b = jax.random.normal(k[10], (1, C, D2, H2, W2), jnp.float32)
    refb = cell_spe_reference(s0b, s1b, alphas, wconv, wend,
                              bn_gamma, bn_beta, bn_mean, bn_var)
    outb = cell_spe_forward(s0b, s1b, alphas, wconv, wend,
                            bn_gamma, bn_beta, bn_mean, bn_var)
    outb = jax.block_until_ready(outb)
    np.testing.assert_allclose(np.asarray(outb), np.asarray(refb),
                               rtol=1e-3, atol=1e-3)
    assert outb.shape == (1, C_OUT, D2, H2, W2)

    print("KERNEL_OK")
</pallas_src>

<mosaic_0001>
module attributes {stable_mosaic.version = 11 : i64} {
  func.func @_cell_kernel(%arg0: i32, %arg1: i32, %arg2: memref<32x8xf32, #tpu.memory_space<vmem>>, %arg3: memref<32x8xf32, #tpu.memory_space<vmem>>, %arg4: memref<32x1xf32, #tpu.memory_space<vmem>>, %arg5: memref<1x8x4096xf32, #tpu.memory_space<vmem>>, %arg6: memref<1x8x4096xf32, #tpu.memory_space<vmem>>, %arg7: memref<1x32x4096xf32, #tpu.memory_space<vmem>>) attributes {dimension_semantics = [#tpu.dimension_semantics<parallel>, #tpu.dimension_semantics<parallel>], iteration_bounds = array<i64: 2, 1>, scalar_prefetch = 0 : i64, scratch_operands = 0 : i64, tpu.core_type = #tpu.core_type<tc>, window_params = [{pipeline_mode = #tpu.pipeline_mode<synchronous>, transform_indices = @transform_0, window_bounds = array<i64: 32, 8>}, {pipeline_mode = #tpu.pipeline_mode<synchronous>, transform_indices = @transform_1, window_bounds = array<i64: 32, 8>}, {pipeline_mode = #tpu.pipeline_mode<synchronous>, transform_indices = @transform_2, window_bounds = array<i64: 32, 1>}, {transform_indices = @transform_3, window_bounds = array<i64: 1, 8, 4096>}, {transform_indices = @transform_4, window_bounds = array<i64: 1, 8, 4096>}, {transform_indices = @transform_5, window_bounds = array<i64: 1, 32, 4096>}]} {
    %c0 = arith.constant 0 : index
    %c0_0 = arith.constant 0 : index
    %0 = vector.load %arg2[%c0, %c0_0] : memref<32x8xf32, #tpu.memory_space<vmem>>, vector<32x8xf32>
    %c0_1 = arith.constant 0 : index
    %c0_2 = arith.constant 0 : index
    %c0_3 = arith.constant 0 : index
    %1 = vector.load %arg5[%c0_1, %c0_2, %c0_3] : memref<1x8x4096xf32, #tpu.memory_space<vmem>>, vector<1x8x4096xf32>
    %2 = vector.shape_cast %1 : vector<1x8x4096xf32> to vector<8x4096xf32>
    %cst = arith.constant dense<0.000000e+00> : vector<32x4096xf32>
    %3 = tpu.matmul %0, %2, %cst {dimension_numbers = #tpu.dot_dimension_numbers<[1], [0], [0], [1], [0, 0, 1, 1], [], []>} : vector<32x8xf32>, vector<8x4096xf32>, vector<32x4096xf32> -> vector<32x4096xf32>
    %c0_4 = arith.constant 0 : index
    %c0_5 = arith.constant 0 : index
    %4 = vector.load %arg3[%c0_4, %c0_5] : memref<32x8xf32, #tpu.memory_space<vmem>>, vector<32x8xf32>
    %c0_6 = arith.constant 0 : index
    %c0_7 = arith.constant 0 : index
    %c0_8 = arith.constant 0 : index
    %5 = vector.load %arg6[%c0_6, %c0_7, %c0_8] : memref<1x8x4096xf32, #tpu.memory_space<vmem>>, vector<1x8x4096xf32>
    %6 = vector.shape_cast %5 : vector<1x8x4096xf32> to vector<8x4096xf32>
    %cst_9 = arith.constant dense<0.000000e+00> : vector<32x4096xf32>
    %7 = tpu.matmul %4, %6, %cst_9 {dimension_numbers = #tpu.dot_dimension_numbers<[1], [0], [0], [1], [0, 0, 1, 1], [], []>} : vector<32x8xf32>, vector<8x4096xf32>, vector<32x4096xf32> -> vector<32x4096xf32>
    %8 = arith.addf %3, %7 : vector<32x4096xf32>
    %c0_10 = arith.constant 0 : index
    %c0_11 = arith.constant 0 : index
    %9 = vector.load %arg4[%c0_10, %c0_11] : memref<32x1xf32, #tpu.memory_space<vmem>>, vector<32x1xf32>
    %10 = vector.broadcast %9 : vector<32x1xf32> to vector<32x4096xf32>
    %11 = arith.addf %8, %10 : vector<32x4096xf32>
    %cst_12 = arith.constant 2.000000e-01 : f32
    %12 = vector.broadcast %cst_12 : f32 to vector<32x4096xf32>
    %13 = arith.mulf %12, %11 : vector<32x4096xf32>
    %14 = arith.maximumf %11, %13 : vector<32x4096xf32>
    %c0_13 = arith.constant 0 : index
    %c0_14 = arith.constant 0 : index
    %c0_15 = arith.constant 0 : index
    %15 = vector.load %arg7[%c0_13, %c0_14, %c0_15] : memref<1x32x4096xf32, #tpu.memory_space<vmem>>, vector<1x32x4096xf32>
    %16 = vector.shape_cast %15 : vector<1x32x4096xf32> to vector<32x4096xf32>
    %17 = vector.shape_cast %14 : vector<32x4096xf32> to vector<1x32x4096xf32>
    tpu.vector_store %arg7[%c0_13, %c0_14, %c0_15], %17 {strides = array<i32>} : memref<1x32x4096xf32, #tpu.memory_space<vmem>>, vector<1x32x4096xf32>,
    return
  }
  func.func @transform_0(%arg0: i32, %arg1: i32) -> (i32, i32) {
    %c0_i32 = arith.constant 0 : i32
    %c0_i32_0 = arith.constant 0 : i32
    %c0_i32_1 = arith.constant 0 : i32
    return %c0_i32, %c0_i32_0 : i32, i32
  }
  func.func @transform_1(%arg0: i32, %arg1: i32) -> (i32, i32) {
    %c0_i32 = arith.constant 0 : i32
    %c0_i32_0 = arith.constant 0 : i32
    %c0_i32_1 = arith.constant 0 : i32
    return %c0_i32, %c0_i32_0 : i32, i32
  }
  func.func @transform_2(%arg0: i32, %arg1: i32) -> (i32, i32) {
    %c0_i32 = arith.constant 0 : i32
    %c0_i32_0 = arith.constant 0 : i32
    %c0_i32_1 = arith.constant 0 : i32
    return %c0_i32, %c0_i32_0 : i32, i32
  }
  func.func @transform_3(%arg0: i32, %arg1: i32) -> (i32, i32, i32) {
    %c0_i32 = arith.constant 0 : i32
    %c0_i32_0 = arith.constant 0 : i32
    return %arg0, %c0_i32, %arg1 : i32, i32, i32
  }
  func.func @transform_4(%arg0: i32, %arg1: i32) -> (i32, i32, i32) {
    %c0_i32 = arith.constant 0 : i32
    %c0_i32_0 = arith.constant 0 : i32
    return %arg0, %c0_i32, %arg1 : i32, i32, i32
  }
  func.func @transform_5(%arg0: i32, %arg1: i32) -> (i32, i32, i32) {
    %c0_i32 = arith.constant 0 : i32
    %c0_i32_0 = arith.constant 0 : i32
    return %arg0, %c0_i32, %arg1 : i32, i32, i32
  }
}

</mosaic_0001>

<bundles_post_ra>
// kernel: tpu_custom_call.1
= control target key start
LH: loop header
LB: loop body
LE: loop exit
PB: predicated region body
PF: predicated region fallthrough
CT: control target
= control target key end

     0   :  { %10 = vsyncpa [#allocation3], 0  ;;  %s4871_s0 = inlined_call_operand.vmem [shape: f32[32,8], index: 0, kind: input, shape index: {}]   ;;  %s4872_s1 = inlined_call_operand.vmem [shape: f32[32,8], index: 1, kind: input, shape index: {}]   ;;  %s4873_s2 = inlined_call_operand.vmem [shape: f32[32,1], index: 2, kind: input, shape index: {}]   ;;  %s4874_s3 = inlined_call_operand.hbm [shape: f32[2,8,4096], index: 3, kind: input, shape index: {}]   ;;  %s4875_s4 = inlined_call_operand.hbm [shape: f32[2,8,4096], index: 4, kind: input, shape index: {}]   ;;  %s4876_s5 = inlined_call_operand.hbm [shape: f32[2,32,4096], index: 5, kind: output, shape index: {}]  }
   0x1   :  { %12 = vsyncpa [#allocation3 + $0x1], 0 }
   0x2   :  { %13 = vsyncpa [#allocation6], 0 }
   0x3   :  { %15 = vsyncpa [#allocation6 + $0x1], 0 }
   0x4   :  { %16 = vsyncpa [#allocation4], 0 }
   0x5   :  { %18 = vsyncpa [#allocation4 + $0x1], 0  ;;  %s3463_s18 = smov 0   ;;  %s3465_s19 = smov 0  }
   0x6   :  { %s3467_s20 = smov 0   ;;  %s3469_s21 = smov 0  }
   0x7   :  { %s3471_s22 = smov 0   ;;  %s3473_s23 = smov 0  }
   0x8 LB: > { %4879 = sst [smem:[#allocation11_spill]] %s3424_s22  ;;  %s2928_s24 = sadd.s32 4294967295, %s3428_s23   ;;  %s3428_s23 = sphi %s3473_s23, %s24_s23   ;;  %s3424_s22 = sphi %s3471_s22, %s5056_s22   ;;  %s3420_s21 = sphi %s3469_s21, %s5055_s21   ;;  %s3416_s20 = sphi %s3467_s20, %s5059_s20   ;;  %s3412_s19 = sphi %s3465_s19, %s5058_s19   ;;  %s3408_s18 = sphi %s3463_s18, %s5057_s18  }
   0x9   : > { %s2929_s25 = sadd.s32 4294967294, %s3428_s23   ;;  %s36_s26 = sadd.s32 1, %s3424_s22 }
   0xa   : > { %s108_s27 = sadd.s32 1, %s3416_s20  ;;  %p38_p0 = scmp.ge.s32.totalorder %s36_s26, 2 }
   0xb   : > { %p115_p1 = scmp.ne.s32.totalorder %s3416_s20, %s3412_s19  ;;  %p116_p2 = scmp.eq.s32.totalorder %s3428_s23, 0 }
   0xc   : > { %p121_p3 = scmp.ne.s32.totalorder %s3412_s19, %s3408_s18  ;;  %s5061_s26 = smov (%p38_p0, %s36_s26), 0 }
   0xd   : > { %4880 = sst [smem:[#allocation12_spill]] %s5061_s26  ;;  %p3504_p4 = por %p116_p2, %p115_p1 }
   0xe   : > { %p122_p5 = scmp.eq.s32.totalorder %s2928_s24, 0  ;;  %s103_s29 = ssub.s32 %s3424_s22, %s5061_s26 }
   0xf   : > { %p175_p6 = scmp.eq.s32.totalorder %s2928_s24, 1  ;;  %p106_p7 = scmp.eq.s32.totalorder %s103_s29, 0 }
  0x10   : > { %p3510_p8 = por %p122_p5, %p121_p3  ;;  %p181_p10 = scmp.eq.s32.totalorder %s2929_s25, 1 }
  0x11   : > { %p3514_p9 = por %p175_p6, %p115_p1  ;;  %p2931_p12 = scmp.ge.s32.totalorder %s3428_s23, 2 }
  0x12   : > { %s3519_s7 = scalar_select %p106_p7, %s3416_s20, %s108_s27  }
  0x13   : > { %p3521_p11 = por %p181_p10, %p121_p3  ;;  %p3223_p13 = scmp.lt.s32.totalorder %s3428_s23, 2 }
  0x14   : > { %s210_s9 = sand.u32 1, %s3416_s20   ;;  %s3203_s11 = sshll.u32 %s3424_s22, 8 }
  0x15   : > { %s2932_s10 = sshll.u32 %s210_s9, 8  ;;  %s221_s14 = scalar_lea.hbm %s4874_s3, %s3203_s11 }
  0x16   : > { %s214_s15 = scalar_lea.vmem [#allocation2], %s2932_s10  ;;  %s223_s17 = sshll.u32 %s221_s14, 4  ;;  %s224_s17 = int_to_ptr.hbm [resolvable:$true] %s223_s17 }
  0x17   : > { %s225_s16 = sshll.u32 %s214_s15, 4  ;;  %p3213_p0 = pnand %p3223_p13, %p3504_p4  ;;  %s226_s16 = int_to_ptr.vmem [resolvable:$true] %s225_s16 }
  0x18   : > { %p2938_p1 = scmp.ge.s32.totalorder %s3428_s23, 1  ;;  %p252_p2 = scmp.lt.s32.totalorder %s3428_s23, 3 }
  0x19   : > { %s211_s24 = scalar_lea.sflag [#allocation3], %s210_s9  ;;  %s243_s29 = scalar_lea.hbm %s4875_s4, %s3203_s11 }
  0x1a   : > { %3215 = dma.hbm_to_vmem [thread:$0]  (!%p3213_p0), %s224_s17, 4096, %s226_s16, %s211_s24  }
  0x1b   : > { %p253_p3 = pnand %p2938_p1, %p252_p2  ;;  %s236_s26 = scalar_lea.vmem [#allocation5], %s2932_s10 }
  0x1c   : > { %s247_s22 = sshll.u32 %s236_s26, 4  ;;  %s245_s12 = sshll.u32 %s243_s29, 4  ;;  %s248_s22 = int_to_ptr.vmem [resolvable:$true] %s247_s22  ;;  %s246_s12 = int_to_ptr.hbm [resolvable:$true] %s245_s12 }
  0x1d   : > { %s233_s13 = scalar_lea.sflag [#allocation6], %s210_s9  ;;  %256 = sbr.rel (%p253_p3) target bundleno = 693 (0x2b5), region = 40 }
  0x1e   : > { %3218 = dma.hbm_to_vmem [thread:$0]  (!%p3213_p0), %s246_s12, 4096, %s248_s22, %s233_s13  }
  0x22   : > { %s3540_s28 = sand.u32 1, %s3412_s19  }
  0x23   : > { %s2939_s14 = sshll.u32 %s3540_s28, 8  ;;  %s259_s15 = scalar_lea.sflag [#allocation3], %s3540_s28 }
  0x24   : > { %s3544_s16 = scalar_lea.vmem [#allocation2], %s2939_s14 }
  0x25   : > { %3395 = dma.done.wait (%p3510_p8), %s259_s15, 4096  }
  0x26   : > { %3397 = vsyncadd (%p3510_p8), %s259_s15, 4294963200  ;;  %s269_s26 = scalar_lea.sflag [#allocation6], %s3540_s28  ;;  %s3551_s22 = scalar_lea.vmem [#allocation5], %s2939_s14 }
  0x27   : > { %3399 = dma.done.wait (%p3510_p8), %s269_s26, 4096  }
  0x28   : > { %3401 = vsyncadd (%p3510_p8), %s269_s26, 4294963200  ;;  %v348_v0 = vld [vmem:[%s3551_s22] sm:$0xff]  ;;  %v349_v1 = vld [vmem:[%s3551_s22 + $0x8] sm:$0xff]  ;;  %vm380_vm0 = vcmask 64512   ;;  %s2941_s12 = sshll.u32 %s3540_s28, 10  ;;  %s3205_s11 = sshll.u32 %s3420_s21, 10 }
  0x29   : > { %v350_v2 = vld [vmem:[%s3551_s22 + $0x10] sm:$0xff]  ;;  %408 = vmatpush.msra.mxu0 %v348_v0  ;;  %437 = vmatpush.msra.mxu1 %v349_v1  ;;  %v351_v3 = vld [vmem:[%s3551_s22 + $0x18] sm:$0xff]  ;;  %v3564_v4 = vld [vmem:[%s4872_s1] sm:$0xff]  ;;  %s4324_s13 = scalar_lea.vmem [#allocation7], %s2941_s12  ;;  %s2811_s25 = scalar_lea.hbm %s4876_s5, %s3205_s11 }
  0x2a   : > { %466 = vmatpush.msra.mxu2 %v350_v2  ;;  %495 = vmatpush.msra.mxu3 %v351_v3  ;;  %v354_v5 = vld [vmem:[%s3551_s22 + $0x30] sm:$0xff]  ;;  %v355_v6 = vld [vmem:[%s3551_s22 + $0x38] sm:$0xff]  ;;  %v352_v7 = vld [vmem:[%s3551_s22 + $0x20] sm:$0xff]  ;;  %s2812_s21 = sshll.u32 %s4324_s13, 4  ;;  %s2814_s27 = sshll.u32 %s2811_s25, 4  ;;  %s2813_s21 = int_to_ptr.vmem [resolvable:$true] %s2812_s21  ;;  %s2815_s27 = int_to_ptr.hbm [resolvable:$true] %s2814_s27 }
  0x2b   : > { %2942 = vmatmul.msk.f32.vlgmr.msra.gmra.mxu0 %vm380_vm0, %v3564_v4  ;;  %2946 = vmatmul.msk.f32.vlgmr.msra.gmra.mxu1 %vm380_vm0, %v3564_v4  ;;  %v353_v8 = vld [vmem:[%s3551_s22 + $0x28] sm:$0xff]  ;;  %v358_v9 = vld [vmem:[%s3551_s22 + $0x50] sm:$0xff]  ;;  %v359_v10 = vld [vmem:[%s3551_s22 + $0x58] sm:$0xff]  ;;  %s2798_s29 = scalar_lea.sflag [#allocation4], %s3540_s28  ;;  %s3356_s12 = sshra.s32 %s2815_s27, 4  ;;  %s3357_s12 = int_to_ptr.hbm [resolvable:$true] %s3356_s12 }
  0x2c   : > { %2950 = vmatmul.msk.f32.vlgmr.msra.gmra.mxu2 %vm380_vm0, %v3564_v4  ;;  %2954 = vmatmul.msk.f32.vlgmr.msra.gmra.mxu3 %vm380_vm0, %v3564_v4  ;;  %v356_v11 = vld [vmem:[%s3551_s22 + $0x40] sm:$0xff]  ;;  %v357_v12 = vld [vmem:[%s3551_s22 + $0x48] sm:$0xff]  ;;  %v3598_v14 = vld [vmem:[%s4872_s1 + $0x10] sm:$0xff]  ;;  %s3362_s26 = scalar_lea.hbm %s4876_s5, 2048  ;;  %p3363_p7 = scmp.lt.s32.totalorder %s3357_s12, %s4876_s5 }
  0x2d   : > { %582 = vmatpush.msrb.mxu2 %v354_v5  ;;  %611 = vmatpush.msrb.mxu3 %v355_v6  ;;  %v3585_v13 = vld [vmem:[%s4872_s1 + $0x8] sm:$0xff]  ;;  %v3611_v15 = vld [vmem:[%s4872_s1 + $0x18] sm:$0xff]  ;;  %v362_v16 = vld [vmem:[%s3551_s22 + $0x70] sm:$0xff] }
  0x2e   : > { %524 = vmatpush.msrb.mxu0 %v352_v7  ;;  %553 = vmatpush.msrb.mxu1 %v353_v8  ;;  %v363_v17 = vld [vmem:[%s3551_s22 + $0x78] sm:$0xff]  ;;  %v360_v18 = vld [vmem:[%s3551_s22 + $0x60] sm:$0xff]  ;;  %v361_v19 = vld [vmem:[%s3551_s22 + $0x68] sm:$0xff] }
  0x2f   : > { %698 = vmatpush.msra.mxu2 %v358_v9  ;;  %727 = vmatpush.msra.mxu3 %v359_v10  ;;  %v366_v20 = vld [vmem:[%s3551_s22 + $0x90] sm:$0xff]  ;;  %v367_v21 = vld [vmem:[%s3551_s22 + $0x98] sm:$0xff]  ;;  %v364_v22 = vld [vmem:[%s3551_s22 + $0x80] sm:$0xff] }
  0x30   : > { %640 = vmatpush.msra.mxu0 %v356_v11  ;;  %669 = vmatpush.msra.mxu1 %v357_v12  ;;  %v365_v23 = vld [vmem:[%s3551_s22 + $0x88] sm:$0xff]  ;;  %v370_v24 = vld [vmem:[%s3551_s22 + $0xb0] sm:$0xff]  ;;  %v371_v25 = vld [vmem:[%s3551_s22 + $0xb8] sm:$0xff] }
  0x31   : > { %v368_v26 = vld [vmem:[%s3551_s22 + $0xa0] sm:$0xff]  ;;  %v369_v27 = vld [vmem:[%s3551_s22 + $0xa8] sm:$0xff]  ;;  %v374_v30 = vld [vmem:[%s3551_s22 + $0xd0] sm:$0xff] }
  0x32   : > { %v375_v31 = vld [vmem:[%s3551_s22 + $0xd8] sm:$0xff]  ;;  %v372_v36 = vld [vmem:[%s3551_s22 + $0xc0] sm:$0xff]  ;;  %v373_v37 = vld [vmem:[%s3551_s22 + $0xc8] sm:$0xff] }
  0x33   : > { %2943 = vmatmul.msk.f32.gmra.mxu0 %vm380_vm0, %v3585_v13  ;;  %2947 = vmatmul.msk.f32.gmra.mxu1 %vm380_vm0, %v3585_v13  ;;  %v378_v50 = vld [vmem:[%s3551_s22 + $0xf0] sm:$0xff]  ;;  %v379_v51 = vld [vmem:[%s3551_s22 + $0xf8] sm:$0xff]  ;;  %v376_v56 = vld [vmem:[%s3551_s22 + $0xe0] sm:$0xff] }
  0x34   : > { %2951 = vmatmul.msk.f32.gmra.mxu2 %vm380_vm0, %v3585_v13  ;;  %2955 = vmatmul.msk.f32.gmra.mxu3 %vm380_vm0, %v3585_v13  ;;  %v377_v57 = vld [vmem:[%s3551_s22 + $0xe8] sm:$0xff]  ;;  %v314_v7 = vld [vmem:[%s3544_s16 + $0x10] sm:$0xff]  ;;  %v315_v8 = vld [vmem:[%s3544_s16 + $0x18] sm:$0xff] }
  0x3b   : > { %2944 = vmatmul.msk.f32.gmra.mxu0 %vm380_vm0, %v3598_v14  ;;  %2948 = vmatmul.msk.f32.gmra.mxu1 %vm380_vm0, %v3598_v14 }
  0x3c   : > { %2952 = vmatmul.msk.f32.gmra.mxu2 %vm380_vm0, %v3598_v14  ;;  %2956 = vmatmul.msk.f32.gmra.mxu3 %vm380_vm0, %v3598_v14 }
  0x43   : > { %2945 = vmatmul.msk.f32.gmra.mxu0 %vm380_vm0, %v3611_v15  ;;  %2949 = vmatmul.msk.f32.gmra.mxu1 %vm380_vm0, %v3611_v15 }
  0x44   : > { %2953 = vmatmul.msk.f32.gmra.mxu2 %vm380_vm0, %v3611_v15  ;;  %2957 = vmatmul.msk.f32.gmra.mxu3 %vm380_vm0, %v3611_v15 }
  0x4b   : > { %2958 = vmatmul.msk.f32.vlgmr.msrb.gmra.mxu0 %vm380_vm0, %v3564_v4  ;;  %2962 = vmatmul.msk.f32.vlgmr.msrb.gmra.mxu1 %vm380_vm0, %v3564_v4 }
  0x4c   : > { %2966 = vmatmul.msk.f32.vlgmr.msrb.gmra.mxu2 %vm380_vm0, %v3564_v4  ;;  %2970 = vmatmul.msk.f32.vlgmr.msrb.gmra.mxu3 %vm380_vm0, %v3564_v4 }
  0x4d   : > { %814 = vmatpush.msrb.mxu2 %v362_v16  ;;  %843 = vmatpush.msrb.mxu3 %v363_v17  ;;  %v312_v16 = vld [vmem:[%s3544_s16] sm:$0xff]  ;;  %v313_v17 = vld [vmem:[%s3544_s16 + $0x8] sm:$0xff] }
  0x4e   : > { %756 = vmatpush.msrb.mxu0 %v360_v18  ;;  %785 = vmatpush.msrb.mxu1 %v361_v19 }
  0x53   : > { %2959 = vmatmul.msk.f32.gmra.mxu0 %vm380_vm0, %v3585_v13  ;;  %2963 = vmatmul.msk.f32.gmra.mxu1 %vm380_vm0, %v3585_v13 }
  0x54   : > { %2967 = vmatmul.msk.f32.gmra.mxu2 %vm380_vm0, %v3585_v13  ;;  %2971 = vmatmul.msk.f32.gmra.mxu3 %vm380_vm0, %v3585_v13 }
  0x5b   : > { %2960 = vmatmul.msk.f32.gmra.mxu0 %vm380_vm0, %v3598_v14  ;;  %2964 = vmatmul.msk.f32.gmra.mxu1 %vm380_vm0, %v3598_v14 }
  0x5c   : > { %2968 = vmatmul.msk.f32.gmra.mxu2 %vm380_vm0, %v3598_v14  ;;  %2972 = vmatmul.msk.f32.gmra.mxu3 %vm380_vm0, %v3598_v14 }
  0x63   : > { %2961 = vmatmul.msk.f32.gmra.mxu0 %vm380_vm0, %v3611_v15  ;;  %2965 = vmatmul.msk.f32.gmra.mxu1 %vm380_vm0, %v3611_v15 }
  0x64   : > { %2969 = vmatmul.msk.f32.gmra.mxu2 %vm380_vm0, %v3611_v15  ;;  %2973 = vmatmul.msk.f32.gmra.mxu3 %vm380_vm0, %v3611_v15 }
  0x6b   : > { %2974 = vmatmul.msk.f32.vlgmr.msra.gmra.mxu0 %vm380_vm0, %v3564_v4  ;;  %2978 = vmatmul.msk.f32.vlgmr.msra.gmra.mxu1 %vm380_vm0, %v3564_v4 }
  0x6c   : > { %2982 = vmatmul.msk.f32.vlgmr.msra.gmra.mxu2 %vm380_vm0, %v3564_v4  ;;  %2986 = vmatmul.msk.f32.vlgmr.msra.gmra.mxu3 %vm380_vm0, %v3564_v4 }
  0x6d   : > { %930 = vmatpush.msra.mxu2 %v366_v20  ;;  %959 = vmatpush.msra.mxu3 %v367_v21 }
  0x6e   : > { %872 = vmatpush.msra.mxu0 %v364_v22  ;;  %901 = vmatpush.msra.mxu1 %v365_v23 }
  0x73   : > { %2975 = vmatmul.msk.f32.gmra.mxu0 %vm380_vm0, %v3585_v13  ;;  %2979 = vmatmul.msk.f32.gmra.mxu1 %vm380_vm0, %v3585_v13 }
  0x74   : > { %2983 = vmatmul.msk.f32.gmra.mxu2 %vm380_vm0, %v3585_v13  ;;  %2987 = vmatmul.msk.f32.gmra.mxu3 %vm380_vm0, %v3585_v13 }
  0x7b   : > { %2976 = vmatmul.msk.f32.gmra.mxu0 %vm380_vm0, %v3598_v14  ;;  %2980 = vmatmul.msk.f32.gmra.mxu1 %vm380_vm0, %v3598_v14 }
  0x7c   : > { %2984 = vmatmul.msk.f32.gmra.mxu2 %vm380_vm0, %v3598_v14  ;;  %2988 = vmatmul.msk.f32.gmra.mxu3 %vm380_vm0, %v3598_v14 }
  0x83   : > { %2977 = vmatmul.msk.f32.gmra.mxu0 %vm380_vm0, %v3611_v15  ;;  %2981 = vmatmul.msk.f32.gmra.mxu1 %vm380_vm0, %v3611_v15 }
  0x84   : > { %2985 = vmatmul.msk.f32.gmra.mxu2 %vm380_vm0, %v3611_v15  ;;  %2989 = vmatmul.msk.f32.gmra.mxu3 %vm380_vm0, %v3611_v15 }
  0x8b   : > { %2990 = vmatmul.msk.f32.vlgmr.msrb.gmra.mxu0 %vm380_vm0, %v3564_v4  ;;  %2994 = vmatmul.msk.f32.vlgmr.msrb.gmra.mxu1 %vm380_vm0, %v3564_v4 }
  0x8c   : > { %2998 = vmatmul.msk.f32.vlgmr.msrb.gmra.mxu2 %vm380_vm0, %v3564_v4  ;;  %3002 = vmatmul.msk.f32.vlgmr.msrb.gmra.mxu3 %vm380_vm0, %v3564_v4 }
  0x8d   : > { %1046 = vmatpush.msrb.mxu2 %v370_v24  ;;  %1075 = vmatpush.msrb.mxu3 %v371_v25 }
  0x8e   : > { %988 = vmatpush.msrb.mxu0 %v368_v26  ;;  %1017 = vmatpush.msrb.mxu1 %v369_v27 }
  0x93   : > { %2991 = vmatmul.msk.f32.gmra.mxu0 %vm380_vm0, %v3585_v13  ;;  %2995 = vmatmul.msk.f32.gmra.mxu1 %vm380_vm0, %v3585_v13 }
  0x94   : > { %2999 = vmatmul.msk.f32.gmra.mxu2 %vm380_vm0, %v3585_v13  ;;  %3003 = vmatmul.msk.f32.gmra.mxu3 %vm380_vm0, %v3585_v13 }
  0x9b   : > { %2992 = vmatmul.msk.f32.gmra.mxu0 %vm380_vm0, %v3598_v14  ;;  %2996 = vmatmul.msk.f32.gmra.mxu1 %vm380_vm0, %v3598_v14 }
  0x9c   : > { %3000 = vmatmul.msk.f32.gmra.mxu2 %vm380_vm0, %v3598_v14  ;;  %3004 = vmatmul.msk.f32.gmra.mxu3 %vm380_vm0, %v3598_v14 }
  0xa3   : > { %2993 = vmatmul.msk.f32.gmra.mxu0 %vm380_vm0, %v3611_v15  ;;  %2997 = vmatmul.msk.f32.gmra.mxu1 %vm380_vm0, %v3611_v15 }
  0xa4   : > { %3001 = vmatmul.msk.f32.gmra.mxu2 %vm380_vm0, %v3611_v15  ;;  %3005 = vmatmul.msk.f32.gmra.mxu3 %vm380_vm0, %v3611_v15 }
  0xa8   : > { %v3729_v28 = vpop.f32.mrf.mxu0  ;;  %v3731_v29 = vpop.f32.mrf.mxu1 }
  0xab   : > { %3006 = vmatmul.msk.f32.vlgmr.msra.gmra.mxu0 %vm380_vm0, %v3564_v4  ;;  %3010 = vmatmul.msk.f32.vlgmr.msra.gmra.mxu1 %vm380_vm0, %v3564_v4 }
  0xac   : > { %3014 = vmatmul.msk.f32.vlgmr.msra.gmra.mxu2 %vm380_vm0, %v3564_v4  ;;  %3018 = vmatmul.msk.f32.vlgmr.msra.gmra.mxu3 %vm380_vm0, %v3564_v4 }
  0xad   : > { %1162 = vmatpush.msra.mxu2 %v374_v30  ;;  %1191 = vmatpush.msra.mxu3 %v375_v31 }
  0xae   : > { %1104 = vmatpush.msra.mxu0 %v372_v36  ;;  %1133 = vmatpush.msra.mxu1 %v373_v37  ;;  %v318_v36 = vld [vmem:[%s3544_s16 + $0x30] sm:$0xff]  ;;  %v319_v37 = vld [vmem:[%s3544_s16 + $0x38] sm:$0xff] }
  0xaf   : > { %v3743_v32 = vpop.f32.mrf.mxu2  ;;  %v3745_v33 = vpop.f32.mrf.mxu3 }
  0xb0   : > { %v3747_v34 = vpop.f32.mrf.mxu0  ;;  %v3749_v35 = vpop.f32.mrf.mxu1 }
  0xb3   : > { %3007 = vmatmul.msk.f32.gmra.mxu0 %vm380_vm0, %v3585_v13  ;;  %3011 = vmatmul.msk.f32.gmra.mxu1 %vm380_vm0, %v3585_v13 }
  0xb4   : > { %3015 = vmatmul.msk.f32.gmra.mxu2 %vm380_vm0, %v3585_v13  ;;  %3019 = vmatmul.msk.f32.gmra.mxu3 %vm380_vm0, %v3585_v13 }
  0xb7   : > { %v3761_v38 = vpop.f32.mrf.mxu2  ;;  %v3763_v39 = vpop.f32.mrf.mxu3 }
  0xb8   : > { %v3765_v40 = vpop.f32.mrf.mxu0  ;;  %v3767_v41 = vpop.f32.mrf.mxu1 }
  0xbb   : > { %3008 = vmatmul.msk.f32.gmra.mxu0 %vm380_vm0, %v3598_v14  ;;  %3012 = vmatmul.msk.f32.gmra.mxu1 %vm380_vm0, %v3598_v14 }
  0xbc   : > { %3016 = vmatmul.msk.f32.gmra.mxu2 %vm380_vm0, %v3598_v14  ;;  %3020 = vmatmul.msk.f32.gmra.mxu3 %vm380_vm0, %v3598_v14 }
  0xbf   : > { %v3777_v42 = vpop.f32.mrf.mxu2  ;;  %v3779_v43 = vpop.f32.mrf.mxu3 }
  0xc0   : > { %v3781_v44 = vpop.f32.mrf.mxu0  ;;  %v3783_v45 = vpop.f32.mrf.mxu1 }
  0xc3   : > { %3009 = vmatmul.msk.f32.gmra.mxu0 %vm380_vm0, %v3611_v15  ;;  %3013 = vmatmul.msk.f32.gmra.mxu1 %vm380_vm0, %v3611_v15 }
  0xc4   : > { %3017 = vmatmul.msk.f32.gmra.mxu2 %vm380_vm0, %v3611_v15  ;;  %3021 = vmatmul.msk.f32.gmra.mxu3 %vm380_vm0, %v3611_v15 }
  0xc7   : > { %v3793_v46 = vpop.f32.mrf.mxu2  ;;  %v3795_v47 = vpop.f32.mrf.mxu3 }
  0xc8   : > { %v3797_v48 = vpop.f32.mrf.mxu0  ;;  %v3799_v49 = vpop.f32.mrf.mxu1 }
  0xcb   : > { %3022 = vmatmul.msk.f32.vlgmr.msrb.gmra.mxu0 %vm380_vm0, %v3564_v4  ;;  %3026 = vmatmul.msk.f32.vlgmr.msrb.gmra.mxu1 %vm380_vm0, %v3564_v4 }
  0xcc   : > { %3030 = vmatmul.msk.f32.vlgmr.msrb.gmra.mxu2 %vm380_vm0, %v3564_v4  ;;  %3034 = vmatmul.msk.f32.vlgmr.msrb.gmra.mxu3 %vm380_vm0, %v3564_v4 }
  0xcd   : > { %1278 = vmatpush.msrb.mxu2 %v378_v50  ;;  %1307 = vmatpush.msrb.mxu3 %v379_v51 }
  0xce   : > { %1220 = vmatpush.msrb.mxu0 %v376_v56  ;;  %1249 = vmatpush.msrb.mxu1 %v377_v57 }
  0xcf   : > { %v3811_v52 = vpop.f32.mrf.mxu2  ;;  %v3813_v53 = vpop.f32.mrf.mxu3 }
  0xd0   : > { %v3815_v54 = vpop.f32.mrf.mxu0  ;;  %v3817_v55 = vpop.f32.mrf.mxu1 }
  0xd3   : > { %3023 = vmatmul.msk.f32.gmra.mxu0 %vm380_vm0, %v3585_v13  ;;  %3027 = vmatmul.msk.f32.gmra.mxu1 %vm380_vm0, %v3585_v13 }
  0xd4   : > { %3031 = vmatmul.msk.f32.gmra.mxu2 %vm380_vm0, %v3585_v13  ;;  %3035 = vmatmul.msk.f32.gmra.mxu3 %vm380_vm0, %v3585_v13 }
  0xd7   : > { %v3829_v58 = vpop.f32.mrf.mxu2  ;;  %v3831_v59 = vpop.f32.mrf.mxu3 }
  0xd8   : > { %v3833_v60 = vpop.f32.mrf.mxu0  ;;  %v3835_v61 = vpop.f32.mrf.mxu1 }
  0xdb   : > { %3024 = vmatmul.msk.f32.gmra.mxu0 %vm380_vm0, %v3598_v14  ;;  %3028 = vmatmul.msk.f32.gmra.mxu1 %vm380_vm0, %v3598_v14 }
  0xdc   : > { %3032 = vmatmul.msk.f32.gmra.mxu2 %vm380_vm0, %v3598_v14  ;;  %3036 = vmatmul.msk.f32.gmra.mxu3 %vm380_vm0, %v3598_v14 }
  0xdf   : > { %v3845_v62 = vpop.f32.mrf.mxu2  ;;  %v3847_v63 = vpop.f32.mrf.mxu3 }
  0xe0   : > { %v3849_v0 = vpop.f32.mrf.mxu0  ;;  %v3851_v1 = vpop.f32.mrf.mxu1 }
  0xe3   : > { %3025 = vmatmul.msk.f32.gmra.mxu0 %vm380_vm0, %v3611_v15  ;;  %3029 = vmatmul.msk.f32.gmra.mxu1 %vm380_vm0, %v3611_v15 }
  0xe4   : > { %3033 = vmatmul.msk.f32.gmra.mxu2 %vm380_vm0, %v3611_v15  ;;  %3037 = vmatmul.msk.f32.gmra.mxu3 %vm380_vm0, %v3611_v15 }
  0xe7   : > { %v3861_v2 = vpop.f32.mrf.mxu2  ;;  %v3863_v3 = vpop.f32.mrf.mxu3 }
  0xe8   : > { %v3865_v5 = vpop.f32.mrf.mxu0  ;;  %v3867_v6 = vpop.f32.mrf.mxu1 }
  0xeb   : > { %3038 = vmatmul.msk.f32.vlgmr.msra.gmra.mxu0 %vm380_vm0, %v3564_v4  ;;  %3042 = vmatmul.msk.f32.vlgmr.msra.gmra.mxu1 %vm380_vm0, %v3564_v4 }
  0xec   : > { %3046 = vmatmul.msk.f32.vlgmr.msra.gmra.mxu2 %vm380_vm0, %v3564_v4  ;;  %3050 = vmatmul.msk.f32.vlgmr.msra.gmra.mxu3 %vm380_vm0, %v3564_v4 }
  0xed   : > { %1406 = vmatpush.msra.mxu2 %v314_v7  ;;  %1435 = vmatpush.msra.mxu3 %v315_v8  ;;  %v316_v7 = vld [vmem:[%s3544_s16 + $0x20] sm:$0xff]  ;;  %v317_v8 = vld [vmem:[%s3544_s16 + $0x28] sm:$0xff] }
  0xee   : > { %1348 = vmatpush.msra.mxu0 %v312_v16  ;;  %1377 = vmatpush.msra.mxu1 %v313_v17  ;;  %v2261_v17 = vld [vmem:[%s4873_s2] sm:$0xff] }
  0xef   : > { %v3879_v9 = vpop.f32.mrf.mxu2  ;;  %v3881_v10 = vpop.f32.mrf.mxu3 }
  0xf0   : > { %v3883_v11 = vpop.f32.mrf.mxu0  ;;  %v3885_v12 = vpop.f32.mrf.mxu1 }
  0xf3   : > { %3039 = vmatmul.msk.f32.gmra.mxu0 %vm380_vm0, %v3585_v13  ;;  %3043 = vmatmul.msk.f32.gmra.mxu1 %vm380_vm0, %v3585_v13 }
  0xf4   : > { %3047 = vmatmul.msk.f32.gmra.mxu2 %vm380_vm0, %v3585_v13  ;;  %3051 = vmatmul.msk.f32.gmra.mxu3 %vm380_vm0, %v3585_v13 }
  0xf7   : > { %v3897_v18 = vpop.f32.mrf.mxu2  ;;  %v3899_v19 = vpop.f32.mrf.mxu3 }
  0xf8   : > { %v3901_v20 = vpop.f32.mrf.mxu0  ;;  %v3903_v21 = vpop.f32.mrf.mxu1 }
  0xfb   : > { %3040 = vmatmul.msk.f32.gmra.mxu0 %vm380_vm0, %v3598_v14  ;;  %3044 = vmatmul.msk.f32.gmra.mxu1 %vm380_vm0, %v3598_v14 }
  0xfc   : > { %3048 = vmatmul.msk.f32.gmra.mxu2 %vm380_vm0, %v3598_v14  ;;  %3052 = vmatmul.msk.f32.gmra.mxu3 %vm380_vm0, %v3598_v14 }
  0xff   : > { %v3913_v22 = vpop.f32.mrf.mxu2  ;;  %v3915_v23 = vpop.f32.mrf.mxu3 }
 0x100   : > { %4885 = vst [vmem:[#allocation13_spill] sm:$0xff] %v3915_v23  ;;  %v3917_v24 = vpop.f32.mrf.mxu0  ;;  %v3919_v25 = vpop.f32.mrf.mxu1 }
 0x101   : > { %4886 = vst [vmem:[#allocation14_spill] sm:$0xff] %v3917_v24 }
 0x102   : > { %4887 = vst [vmem:[#allocation15_spill] sm:$0xff] %v3919_v25 }
 0x103   : > { %3041 = vmatmul.msk.f32.gmra.mxu0 %vm380_vm0, %v3611_v15  ;;  %3045 = vmatmul.msk.f32.gmra.mxu1 %vm380_vm0, %v3611_v15 }
 0x104   : > { %3049 = vmatmul.msk.f32.gmra.mxu2 %vm380_vm0, %v3611_v15  ;;  %3053 = vmatmul.msk.f32.gmra.mxu3 %vm380_vm0, %v3611_v15 }
 0x107   : > { %v3929_v26 = vpop.f32.mrf.mxu2  ;;  %v3931_v27 = vpop.f32.mrf.mxu3 }
 0x108   : > { %4888 = vst [vmem:[#allocation16_spill] sm:$0xff] %v3929_v26  ;;  %v3933_v30 = vpop.f32.mrf.mxu0  ;;  %v3935_v31 = vpop.f32.mrf.mxu1 }
 0x109   : > { %4889 = vst [vmem:[#allocation17_spill] sm:$0xff] %v3931_v27 }
 0x10a   : > { %4890 = vst [vmem:[#allocation18_spill] sm:$0xff] %v3933_v30 }
 0x10b   : > { %4891 = vst [vmem:[#allocation19_spill] sm:$0xff] %v3935_v31  ;;  %3054 = vmatmul.msk.f32.vlgmr.msrb.gmra.mxu0 %vm380_vm0, %v3564_v4  ;;  %3058 = vmatmul.msk.f32.vlgmr.msrb.gmra.mxu1 %vm380_vm0, %v3564_v4 }
 0x10c   : > { %3062 = vmatmul.msk.f32.vlgmr.msrb.gmra.mxu2 %vm380_vm0, %v3564_v4  ;;  %3066 = vmatmul.msk.f32.vlgmr.msrb.gmra.mxu3 %vm380_vm0, %v3564_v4 }
 0x10d   : > { %1522 = vmatpush.msrb.mxu2 %v318_v36  ;;  %1551 = vmatpush.msrb.mxu3 %v319_v37 }
 0x10e   : > { %1464 = vmatpush.msrb.mxu0 %v316_v7  ;;  %1493 = vmatpush.msrb.mxu1 %v317_v8  ;;  %v3430_v7 = vmov 0  }
 0x10f   : > { %v3947_v50 = vpop.f32.mrf.mxu2  ;;  %v3949_v51 = vpop.f32.mrf.mxu3  ;;  %3276 = vset.pattern.permute.xlu0 %v3430_v7  ;;  %3277 = vset.pattern.permute.xlu1 %v3430_v7 }
 0x110   : > { %4892 = vst [vmem:[#allocation20_spill] sm:$0xff] %v3947_v50  ;;  %v3951_v56 = vpop.f32.mrf.mxu0  ;;  %v3953_v57 = vpop.f32.mrf.mxu1  ;;  %2267 = vperm.xlu0 %3276, %v2261_v17   ;;  %v2262_v17 = vld [vmem:[%s4873_s2 + $0x8] sm:$0xff] }
 0x111   : > { %4893 = vst [vmem:[#allocation21_spill] sm:$0xff] %v3949_v51 }
 0x112   : > { %4894 = vst [vmem:[#allocation22_spill] sm:$0xff] %v3951_v56  ;;  %v325_v56 = vld [vmem:[%s3544_s16 + $0x68] sm:$0xff] }
 0x113   : > { %4895 = vst [vmem:[#allocation23_spill] sm:$0xff] %v3953_v57  ;;  %3055 = vmatmul.msk.f32.gmra.mxu0 %vm380_vm0, %v3585_v13  ;;  %3059 = vmatmul.msk.f32.gmra.mxu1 %vm380_vm0, %v3585_v13  ;;  %v324_v57 = vld [vmem:[%s3544_s16 + $0x60] sm:$0xff] }
 0x114   : > { %3063 = vmatmul.msk.f32.gmra.mxu2 %vm380_vm0, %v3585_v13  ;;  %3067 = vmatmul.msk.f32.gmra.mxu3 %vm380_vm0, %v3585_v13 }
 0x117   : > { %v3965_v4 = vpop.f32.mrf.mxu2  ;;  %v3967_v16 = vpop.f32.mrf.mxu3 }
 0x118   : > { %4896 = vst [vmem:[#allocation24_spill] sm:$0xff] %v3965_v4  ;;  %v3972_v36 = vpop.f32.mrf.mxu0  ;;  %v3974_v37 = vpop.f32.mrf.mxu1  ;;  %2272 = vperm.xlu0 %3276, %v2262_v17   ;;  %v2263_v17 = vld [vmem:[%s4873_s2 + $0x10] sm:$0xff] }
 0x119   : > { %4897 = vst [vmem:[#allocation25_spill] sm:$0xff] %v3967_v16  ;;  %2277 = vperm.xlu1 %3277, %v2263_v17   ;;  %v4043_v16 = vld [vmem:[%s4871_s0 + $0x8] sm:$0xff] }
 0x11a   : > { %4898 = vst [vmem:[#allocation26_spill] sm:$0xff] %v3972_v36 }
 0x11b   : > { %4899 = vst [vmem:[#allocation27_spill] sm:$0xff] %v3974_v37  ;;  %3056 = vmatmul.msk.f32.gmra.mxu0 %vm380_vm0, %v3598_v14  ;;  %3060 = vmatmul.msk.f32.gmra.mxu1 %vm380_vm0, %v3598_v14 }
 0x11c   : > { %3064 = vmatmul.msk.f32.gmra.mxu2 %vm380_vm0, %v3598_v14  ;;  %3068 = vmatmul.msk.f32.gmra.mxu3 %vm380_vm0, %v3598_v14 }
 0x11f   : > { %v3984_v13 = vpop.f32.mrf.mxu2  ;;  %v3986_v8 = vpop.f32.mrf.mxu3 }
 0x120   : > { %4900 = vst [vmem:[#allocation28_spill] sm:$0xff] %v3984_v13  ;;  %v3991_v7 = vpop.f32.mrf.mxu0  ;;  %v3993_v37 = vpop.f32.mrf.mxu1  ;;  %v4017_v13 = vld [vmem:[%s4871_s0] sm:$0xff] }
 0x121   : > { %4901 = vst [vmem:[#allocation29_spill] sm:$0xff] %v3986_v8 }
 0x122   : > { %4902 = vst [vmem:[#allocation30_spill] sm:$0xff] %v3991_v7 }
 0x123   : > { %4903 = vst [vmem:[#allocation31_spill] sm:$0xff] %v3993_v37  ;;  %3057 = vmatmul.msk.f32.gmra.mxu0 %vm380_vm0, %v3611_v15  ;;  %3061 = vmatmul.msk.f32.gmra.mxu1 %vm380_vm0, %v3611_v15 }
 0x124   : > { %3065 = vmatmul.msk.f32.gmra.mxu2 %vm380_vm0, %v3611_v15  ;;  %3069 = vmatmul.msk.f32.gmra.mxu3 %vm380_vm0, %v3611_v15  ;;  %v322_v15 = vld [vmem:[%s3544_s16 + $0x50] sm:$0xff] }
 0x127   : > { %v4003_v14 = vpop.f32.mrf.mxu2  ;;  %v4005_v7 = vpop.f32.mrf.mxu3 }
 0x128   : > { %4904 = vst [vmem:[#allocation32_spill] sm:$0xff] %v4003_v14  ;;  %v4010_v37 = vpop.f32.mrf.mxu0  ;;  %v4012_v8 = vpop.f32.mrf.mxu1 }
 0x129   : > { %4905 = vst [vmem:[#allocation33_spill] sm:$0xff] %v4005_v7  ;;  %v2264_v7 = vld [vmem:[%s4873_s2 + $0x18] sm:$0xff] }
 0x12a   : > { %4906 = vst [vmem:[#allocation34_spill] sm:$0xff] %v4010_v37  ;;  %2282 = vperm.xlu1 %3277, %v2264_v7  }
 0x12b   : > { %4907 = vst [vmem:[#allocation35_spill] sm:$0xff] %v4012_v8  ;;  %3070 = vmatmul.msk.f32.vlgmr.msra.gmra.mxu0 %vm380_vm0, %v4017_v13  ;;  %3074 = vmatmul.msk.f32.vlgmr.msra.gmra.mxu1 %vm380_vm0, %v4017_v13  ;;  %v323_v8 = vld [vmem:[%s3544_s16 + $0x58] sm:$0xff] }
 0x12c   : > { %3078 = vmatmul.msk.f32.vlgmr.msra.gmra.mxu2 %vm380_vm0, %v4017_v13  ;;  %3082 = vmatmul.msk.f32.vlgmr.msra.gmra.mxu3 %vm380_vm0, %v4017_v13 }
 0x12d   : > { %1638 = vmatpush.msra.mxu2 %v322_v15  ;;  %1667 = vmatpush.msra.mxu3 %v323_v8  ;;  %v320_v15 = vld [vmem:[%s3544_s16 + $0x40] sm:$0xff]  ;;  %v321_v8 = vld [vmem:[%s3544_s16 + $0x48] sm:$0xff] }
 0x12e   : > { %1580 = vmatpush.msra.mxu0 %v320_v15  ;;  %1609 = vmatpush.msra.mxu1 %v321_v8  ;;  %v4066_v8 = vld [vmem:[%s4871_s0 + $0x10] sm:$0xff] }
 0x12f   : > { %v4029_v37 = vpop.f32.mrf.mxu2  ;;  %v4031_v17 = vpop.f32.mrf.mxu3 }
 0x130   : > { %4908 = vst [vmem:[#allocation36_spill] sm:$0xff] %v4029_v37  ;;  %v4036_v14 = vpop.f32.mrf.mxu0  ;;  %v4038_v36 = vpop.f32.mrf.mxu1  ;;  %v327_v37 = vld [vmem:[%s3544_s16 + $0x78] sm:$0xff] }
 0x131   : > { %4909 = vst [vmem:[#allocation37_spill] sm:$0xff] %v4031_v17  ;;  %v4087_v17 = vld [vmem:[%s4871_s0 + $0x18] sm:$0xff] }
 0x132   : > { %4910 = vst [vmem:[#allocation38_spill] sm:$0xff] %v4036_v14 }
 0x133   : > { %4911 = vst [vmem:[#allocation39_spill] sm:$0xff] %v4038_v36  ;;  %3071 = vmatmul.msk.f32.gmra.mxu0 %vm380_vm0, %v4043_v16  ;;  %3075 = vmatmul.msk.f32.gmra.mxu1 %vm380_vm0, %v4043_v16 }
 0x134   : > { %3079 = vmatmul.msk.f32.gmra.mxu2 %vm380_vm0, %v4043_v16  ;;  %3083 = vmatmul.msk.f32.gmra.mxu3 %vm380_vm0, %v4043_v16 }
 0x137   : > { %v4055_v36 = vpop.f32.mrf.mxu2  ;;  %v4057_v14 = vpop.f32.mrf.mxu3 }
 0x138   : > { %4912 = vst [vmem:[#allocation40_spill] sm:$0xff] %v4055_v36  ;;  %v4059_v7 = vpop.f32.mrf.mxu0  ;;  %v4061_v15 = vpop.f32.mrf.mxu1 }
 0x139   : > { %4913 = vst [vmem:[#allocation41_spill] sm:$0xff] %v4057_v14 }
 0x13a   : > { %4914 = vst [vmem:[#allocation42_spill] sm:$0xff] %v4059_v7 }
 0x13b   : > { %4915 = vst [vmem:[#allocation43_spill] sm:$0xff] %v4061_v15  ;;  %3072 = vmatmul.msk.f32.gmra.mxu0 %vm380_vm0, %v4066_v8  ;;  %3076 = vmatmul.msk.f32.gmra.mxu1 %vm380_vm0, %v4066_v8 }
 0x13c   : > { %3080 = vmatmul.msk.f32.gmra.mxu2 %vm380_vm0, %v4066_v8  ;;  %3084 = vmatmul.msk.f32.gmra.mxu3 %vm380_vm0, %v4066_v8 }
 0x13f   : > { %v4076_v7 = vpop.f32.mrf.mxu2  ;;  %v4078_v15 = vpop.f32.mrf.mxu3 }
 0x140   : > { %4916 = vst [vmem:[#allocation44_spill] sm:$0xff] %v4076_v7  ;;  %v4080_v14 = vpop.f32.mrf.mxu0  ;;  %v4082_v36 = vpop.f32.mrf.mxu1 }
 0x141   : > { %4917 = vst [vmem:[#allocation45_spill] sm:$0xff] %v4078_v15 }
 0x142   : > { %4918 = vst [vmem:[#allocation46_spill] sm:$0xff] %v4080_v14 }
 0x143   : > { %4919 = vst [vmem:[#allocation47_spill] sm:$0xff] %v4082_v36  ;;  %3073 = vmatmul.msk.f32.gmra.mxu0 %vm380_vm0, %v4087_v17  ;;  %3077 = vmatmul.msk.f32.gmra.mxu1 %vm380_vm0, %v4087_v17 }
 0x144   : > { %3081 = vmatmul.msk.f32.gmra.mxu2 %vm380_vm0, %v4087_v17  ;;  %3085 = vmatmul.msk.f32.gmra.mxu3 %vm380_vm0, %v4087_v17 }
 0x147   : > { %v4097_v14 = vpop.f32.mrf.mxu2  ;;  %v4099_v36 = vpop.f32.mrf.mxu3 }
 0x148   : > { %4920 = vst [vmem:[#allocation48_spill] sm:$0xff] %v4097_v14  ;;  %v4101_v15 = vpop.f32.mrf.mxu0  ;;  %v4103_v7 = vpop.f32.mrf.mxu1  ;;  %v326_v14 = vld [vmem:[%s3544_s16 + $0x70] sm:$0xff] }
 0x149   : > { %4921 = vst [vmem:[#allocation49_spill] sm:$0xff] %v4099_v36 }
 0x14a   : > { %4922 = vst [vmem:[#allocation50_spill] sm:$0xff] %v4101_v15 }
 0x14b   : > { %4923 = vst [vmem:[#allocation51_spill] sm:$0xff] %v4103_v7  ;;  %3086 = vmatmul.msk.f32.vlgmr.msrb.gmra.mxu0 %vm380_vm0, %v4017_v13  ;;  %3090 = vmatmul.msk.f32.vlgmr.msrb.gmra.mxu1 %vm380_vm0, %v4017_v13 }
 0x14c   : > { %3094 = vmatmul.msk.f32.vlgmr.msrb.gmra.mxu2 %vm380_vm0, %v4017_v13  ;;  %3098 = vmatmul.msk.f32.vlgmr.msrb.gmra.mxu3 %vm380_vm0, %v4017_v13 }
 0x14d   : > { %1754 = vmatpush.msrb.mxu2 %v326_v14  ;;  %1783 = vmatpush.msrb.mxu3 %v327_v37 }
 0x14e   : > { %1696 = vmatpush.msrb.mxu0 %v324_v57  ;;  %1725 = vmatpush.msrb.mxu1 %v325_v56 }
 0x14f   : > { %v4115_v36 = vpop.f32.mrf.mxu2  ;;  %v4117_v15 = vpop.f32.mrf.mxu3 }
 0x150   : > { %4924 = vst [vmem:[#allocation52_spill] sm:$0xff] %v4115_v36  ;;  %v4119_v7 = vpop.f32.mrf.mxu0  ;;  %v4121_v4 = vpop.f32.mrf.mxu1  ;;  %v329_v36 = vld [vmem:[%s3544_s16 + $0x88] sm:$0xff] }
 0x151   : > { %4925 = vst [vmem:[#allocation53_spill] sm:$0xff] %v4117_v15  ;;  %v328_v15 = vld [vmem:[%s3544_s16 + $0x80] sm:$0xff] }
 0x152   : > { %4926 = vst [vmem:[#allocation54_spill] sm:$0xff] %v4119_v7 }
 0x153   : > { %4927 = vst [vmem:[#allocation55_spill] sm:$0xff] %v4121_v4  ;;  %3087 = vmatmul.msk.f32.gmra.mxu0 %vm380_vm0, %v4043_v16  ;;  %3091 = vmatmul.msk.f32.gmra.mxu1 %vm380_vm0, %v4043_v16 }
 0x154   : > { %3095 = vmatmul.msk.f32.gmra.mxu2 %vm380_vm0, %v4043_v16  ;;  %3099 = vmatmul.msk.f32.gmra.mxu3 %vm380_vm0, %v4043_v16 }
 0x157   : > { %v4133_v37 = vpop.f32.mrf.mxu2  ;;  %v4135_v14 = vpop.f32.mrf.mxu3 }
 0x158   : > { %4928 = vst [vmem:[#allocation56_spill] sm:$0xff] %v4133_v37  ;;  %v4137_v4 = vpop.f32.mrf.mxu0  ;;  %v4139_v57 = vpop.f32.mrf.mxu1  ;;  %v331_v37 = vld [vmem:[%s3544_s16 + $0x98] sm:$0xff] }
 0x159   : > { %4929 = vst [vmem:[#allocation57_spill] sm:$0xff] %v4135_v14 }
 0x15a   : > { %4930 = vst [vmem:[#allocation58_spill] sm:$0xff] %v4137_v4 }
 0x15b   : > { %4931 = vst [vmem:[#allocation59_spill] sm:$0xff] %v4139_v57  ;;  %3088 = vmatmul.msk.f32.gmra.mxu0 %vm380_vm0, %v4066_v8  ;;  %3092 = vmatmul.msk.f32.gmra.mxu1 %vm380_vm0, %v4066_v8 }
 0x15c   : > { %3096 = vmatmul.msk.f32.gmra.mxu2 %vm380_vm0, %v4066_v8  ;;  %3100 = vmatmul.msk.f32.gmra.mxu3 %vm380_vm0, %v4066_v8 }
 0x15f   : > { %v4149_v56 = vpop.f32.mrf.mxu2  ;;  %v4151_v14 = vpop.f32.mrf.mxu3 }
 0x160   : > { %4932 = vst [vmem:[#allocation60_spill] sm:$0xff] %v4149_v56  ;;  %v4153_v4 = vpop.f32.mrf.mxu0  ;;  %v4155_v57 = vpop.f32.mrf.mxu1 }
 0x161   : > { %4933 = vst [vmem:[#allocation61_spill] sm:$0xff] %v4151_v14 }
 0x162   : > { %4934 = vst [vmem:[#allocation62_spill] sm:$0xff] %v4153_v4 }
 0x163   : > { %4935 = vst [vmem:[#allocation63_spill] sm:$0xff] %v4155_v57  ;;  %3089 = vmatmul.msk.f32.gmra.mxu0 %vm380_vm0, %v4087_v17  ;;  %3093 = vmatmul.msk.f32.gmra.mxu1 %vm380_vm0, %v4087_v17 }
 0x164   : > { %3097 = vmatmul.msk.f32.gmra.mxu2 %vm380_vm0, %v4087_v17  ;;  %3101 = vmatmul.msk.f32.gmra.mxu3 %vm380_vm0, %v4087_v17 }
 0x167   : > { %v4165_v56 = vpop.f32.mrf.mxu2  ;;  %v4167_v14 = vpop.f32.mrf.mxu3 }
 0x168   : > { %4936 = vst [vmem:[#allocation64_spill] sm:$0xff] %v4165_v56  ;;  %v4169_v4 = vpop.f32.mrf.mxu0  ;;  %v4171_v57 = vpop.f32.mrf.mxu1  ;;  %v330_v56 = vld [vmem:[%s3544_s16 + $0x90] sm:$0xff] }
 0x169   : > { %4937 = vst [vmem:[#allocation65_spill] sm:$0xff] %v4167_v14 }
 0x16a   : > { %4938 = vst [vmem:[#allocation66_spill] sm:$0xff] %v4169_v4 }
 0x16b   : > { %4939 = vst [vmem:[#allocation67_spill] sm:$0xff] %v4171_v57  ;;  %3102 = vmatmul.msk.f32.vlgmr.msra.gmra.mxu0 %vm380_vm0, %v4017_v13  ;;  %3106 = vmatmul.msk.f32.vlgmr.msra.gmra.mxu1 %vm380_vm0, %v4017_v13 }
 0x16c   : > { %3110 = vmatmul.msk.f32.vlgmr.msra.gmra.mxu2 %vm380_vm0, %v4017_v13  ;;  %3114 = vmatmul.msk.f32.vlgmr.msra.gmra.mxu3 %vm380_vm0, %v4017_v13 }
 0x16d   : > { %1870 = vmatpush.msra.mxu2 %v330_v56  ;;  %1899 = vmatpush.msra.mxu3 %v331_v37 }
 0x16e   : > { %1812 = vmatpush.msra.mxu0 %v328_v15  ;;  %1841 = vmatpush.msra.mxu1 %v329_v36 }
 0x16f   : > { %v4183_v14 = vpop.f32.mrf.mxu2  ;;  %v4185_v4 = vpop.f32.mrf.mxu3 }
 0x170   : > { %4940 = vst [vmem:[#allocation68_spill] sm:$0xff] %v4183_v14  ;;  %v4187_v57 = vpop.f32.mrf.mxu0  ;;  %v4189_v7 = vpop.f32.mrf.mxu1  ;;  %v333_v14 = vld [vmem:[%s3544_s16 + $0xa8] sm:$0xff] }
 0x171   : > { %4941 = vst [vmem:[#allocation69_spill] sm:$0xff] %v4185_v4  ;;  %v332_v4 = vld [vmem:[%s3544_s16 + $0xa0] sm:$0xff] }
 0x172   : > { %4942 = vst [vmem:[#allocation70_spill] sm:$0xff] %v4187_v57  ;;  %v335_v57 = vld [vmem:[%s3544_s16 + $0xb8] sm:$0xff] }
 0x173   : > { %4943 = vst [vmem:[#allocation71_spill] sm:$0xff] %v4189_v7  ;;  %3103 = vmatmul.msk.f32.gmra.mxu0 %vm380_vm0, %v4043_v16  ;;  %3107 = vmatmul.msk.f32.gmra.mxu1 %vm380_vm0, %v4043_v16 }
 0x174   : > { %3111 = vmatmul.msk.f32.gmra.mxu2 %vm380_vm0, %v4043_v16  ;;  %3115 = vmatmul.msk.f32.gmra.mxu3 %vm380_vm0, %v4043_v16 }
 0x177   : > { %v4201_v37 = vpop.f32.mrf.mxu2  ;;  %v4203_v56 = vpop.f32.mrf.mxu3 }
 0x178   : > { %4944 = vst [vmem:[#allocation72_spill] sm:$0xff] %v4201_v37  ;;  %v4205_v7 = vpop.f32.mrf.mxu0  ;;  %v4207_v15 = vpop.f32.mrf.mxu1 }
 0x179   : > { %4945 = vst [vmem:[#allocation73_spill] sm:$0xff] %v4203_v56 }
 0x17a   : > { %4946 = vst [vmem:[#allocation74_spill] sm:$0xff] %v4205_v7 }
 0x17b   : > { %4947 = vst [vmem:[#allocation75_spill] sm:$0xff] %v4207_v15  ;;  %3104 = vmatmul.msk.f32.gmra.mxu0 %vm380_vm0, %v4066_v8  ;;  %3108 = vmatmul.msk.f32.gmra.mxu1 %vm380_vm0, %v4066_v8 }
 0x17c   : > { %3112 = vmatmul.msk.f32.gmra.mxu2 %vm380_vm0, %v4066_v8  ;;  %3116 = vmatmul.msk.f32.gmra.mxu3 %vm380_vm0, %v4066_v8 }
 0x17f   : > { %v4217_v36 = vpop.f32.mrf.mxu2  ;;  %v4219_v37 = vpop.f32.mrf.mxu3 }
 0x180   : > { %4948 = vst [vmem:[#allocation76_spill] sm:$0xff] %v4217_v36  ;;  %v4221_v56 = vpop.f32.mrf.mxu0  ;;  %v4223_v7 = vpop.f32.mrf.mxu1 }
 0x181   : > { %4949 = vst [vmem:[#allocation77_spill] sm:$0xff] %v4219_v37 }
 0x182   : > { %4950 = vst [vmem:[#allocation78_spill] sm:$0xff] %v4221_v56 }
 0x183   : > { %4951 = vst [vmem:[#allocation79_spill] sm:$0xff] %v4223_v7  ;;  %3105 = vmatmul.msk.f32.gmra.mxu0 %vm380_vm0, %v4087_v17  ;;  %3109 = vmatmul.msk.f32.gmra.mxu1 %vm380_vm0, %v4087_v17 }
 0x184   : > { %3113 = vmatmul.msk.f32.gmra.mxu2 %vm380_vm0, %v4087_v17  ;;  %3117 = vmatmul.msk.f32.gmra.mxu3 %vm380_vm0, %v4087_v17 }
 0x187   : > { %v4233_v36 = vpop.f32.mrf.mxu2  ;;  %v4235_v37 = vpop.f32.mrf.mxu3 }
 0x188   : > { %4952 = vst [vmem:[#allocation80_spill] sm:$0xff] %v4233_v36  ;;  %v4237_v56 = vpop.f32.mrf.mxu0  ;;  %v4239_v7 = vpop.f32.mrf.mxu1  ;;  %v334_v36 = vld [vmem:[%s3544_s16 + $0xb0] sm:$0xff] }
 0x189   : > { %4953 = vst [vmem:[#allocation81_spill] sm:$0xff] %v4235_v37 }
 0x18a   : > { %4954 = vst [vmem:[#allocation82_spill] sm:$0xff] %v4237_v56 }
 0x18b   : > { %4955 = vst [vmem:[#allocation83_spill] sm:$0xff] %v4239_v7  ;;  %3118 = vmatmul.msk.f32.vlgmr.msrb.gmra.mxu0 %vm380_vm0, %v4017_v13  ;;  %3122 = vmatmul.msk.f32.vlgmr.msrb.gmra.mxu1 %vm380_vm0, %v4017_v13 }
 0x18c   : > { %3126 = vmatmul.msk.f32.vlgmr.msrb.gmra.mxu2 %vm380_vm0, %v4017_v13  ;;  %3130 = vmatmul.msk.f32.vlgmr.msrb.gmra.mxu3 %vm380_vm0, %v4017_v13 }
 0x18d   : > { %1986 = vmatpush.msrb.mxu2 %v334_v36  ;;  %2015 = vmatpush.msrb.mxu3 %v335_v57 }
 0x18e   : > { %1928 = vmatpush.msrb.mxu0 %v332_v4  ;;  %1957 = vmatpush.msrb.mxu1 %v333_v14  ;;  %v4301_v14 = vpop.permute.xlu0 %2267 }
 0x18f   : > { %v4249_v15 = vpop.f32.mrf.mxu2  ;;  %v4251_v37 = vpop.f32.mrf.mxu3 }
 0x190   : > { %4956 = vst [vmem:[#allocation84_spill] sm:$0xff] %v4249_v15  ;;  %v4253_v56 = vpop.f32.mrf.mxu0  ;;  %v4255_v7 = vpop.f32.mrf.mxu1 }
 0x191   : > { %4957 = vst [vmem:[#allocation85_spill] sm:$0xff] %v4251_v37 }
 0x192   : > { %4958 = vst [vmem:[#allocation86_spill] sm:$0xff] %v4253_v56 }
 0x193   : > { %4959 = vst [vmem:[#allocation87_spill] sm:$0xff] %v4255_v7  ;;  %3119 = vmatmul.msk.f32.gmra.mxu0 %vm380_vm0, %v4043_v16  ;;  %3123 = vmatmul.msk.f32.gmra.mxu1 %vm380_vm0, %v4043_v16 }
 0x194   : > { %3127 = vmatmul.msk.f32.gmra.mxu2 %vm380_vm0, %v4043_v16  ;;  %3131 = vmatmul.msk.f32.gmra.mxu3 %vm380_vm0, %v4043_v16 }
 0x197   : > { %v4267_v37 = vpop.f32.mrf.mxu2  ;;  %v4269_v56 = vpop.f32.mrf.mxu3 }
 0x198   : > { %4960 = vst [vmem:[#allocation88_spill] sm:$0xff] %v4267_v37  ;;  %v4271_v7 = vpop.f32.mrf.mxu0  ;;  %v4273_v15 = vpop.f32.mrf.mxu1 }
 0x199   : > { %4961 = vst [vmem:[#allocation89_spill] sm:$0xff] %v4269_v56 }
 0x19a   : > { %4962 = vst [vmem:[#allocation90_spill] sm:$0xff] %v4271_v7 }
 0x19b   : > { %4963 = vst [vmem:[#allocation91_spill] sm:$0xff] %v4273_v15  ;;  %3120 = vmatmul.msk.f32.gmra.mxu0 %vm380_vm0, %v4066_v8  ;;  %3124 = vmatmul.msk.f32.gmra.mxu1 %vm380_vm0, %v4066_v8 }
 0x19c   : > { %3128 = vmatmul.msk.f32.gmra.mxu2 %vm380_vm0, %v4066_v8  ;;  %3132 = vmatmul.msk.f32.gmra.mxu3 %vm380_vm0, %v4066_v8 }
 0x19f   : > { %v4285_v57 = vpop.f32.mrf.mxu2  ;;  %v4287_v36 = vpop.f32.mrf.mxu3 }
 0x1a0   : > { %4964 = vst [vmem:[#allocation92_spill] sm:$0xff] %v4285_v57  ;;  %v4289_v15 = vpop.f32.mrf.mxu0  ;;  %v4291_v4 = vpop.f32.mrf.mxu1 }
 0x1a1   : > { %4965 = vst [vmem:[#allocation93_spill] sm:$0xff] %v4287_v36 }
 0x1a2   : > { %4966 = vst [vmem:[#allocation94_spill] sm:$0xff] %v4289_v15 }
 0x1a3   : > { %4967 = vst [vmem:[#allocation95_spill] sm:$0xff] %v4291_v4  ;;  %3121 = vmatmul.msk.f32.gmra.mxu0 %vm380_vm0, %v4087_v17  ;;  %3125 = vmatmul.msk.f32.gmra.mxu1 %vm380_vm0, %v4087_v17 }
 0x1a4   : > { %3129 = vmatmul.msk.f32.gmra.mxu2 %vm380_vm0, %v4087_v17  ;;  %3133 = vmatmul.msk.f32.gmra.mxu3 %vm380_vm0, %v4087_v17 }
 0x1a7   : > { %v4303_v57 = vpop.f32.mrf.mxu2  ;;  %v4305_v36 = vpop.f32.mrf.mxu3 }
 0x1a8   : > { %4968 = vst [vmem:[#allocation96_spill] sm:$0xff] %v4303_v57  ;;  %v1350_v15 = vpop.f32.mrf.mxu0  ;;  %v1379_v4 = vpop.f32.mrf.mxu1 }
 0x1a9   : > { %4969 = vst [vmem:[#allocation97_spill] sm:$0xff] %v4305_v36  ;;  %v1351_v7 = vadd.f32 %v1350_v15, %v3729_v28  ;;  %v1380_v56 = vadd.f32 %v1379_v4, %v3731_v29  ;;  %v4320_v29 = vpop.permute.xlu0 %2272 }
 0x1ab   : > { %v2285_v37 = vadd.f32 %v4301_v14, %v1351_v7  ;;  %v2286_v51 = vadd.f32 %v4301_v14, %v1380_v56  ;;  %3134 = vmatmul.msk.f32.vlgmr.msra.gmra.mxu0 %vm380_vm0, %v4017_v13  ;;  %3138 = vmatmul.msk.f32.vlgmr.msra.gmra.mxu1 %vm380_vm0, %v4017_v13 }
 0x1ac   : > { %3142 = vmatmul.msk.f32.vlgmr.msra.gmra.mxu2 %vm380_vm0, %v4017_v13  ;;  %3146 = vmatmul.msk.f32.vlgmr.msra.gmra.mxu3 %vm380_vm0, %v4017_v13 }
 0x1ad   : > { %v2413_v28 = vmul.f32 0.2, %v2285_v37  ;;  %v2414_v15 = vmul.f32 0.2, %v2286_v51 }
 0x1af   : > { %v2541_v4 = vmax.f32 %v2285_v37, %v2413_v28  ;;  %v2542_v7 = vmax.f32 %v2286_v51, %v2414_v15  ;;  %v1408_v36 = vpop.f32.mrf.mxu2  ;;  %v1437_v56 = vpop.f32.mrf.mxu3  ;;  %v339_v15 = vld [vmem:[%s3544_s16 + $0xd8] sm:$0xff] }
 0x1b0   : > { %v1409_v57 = vadd.f32 %v1408_v36, %v3743_v32  ;;  %v1438_v50 = vadd.f32 %v1437_v56, %v3745_v33  ;;  %v1353_v31 = vpop.f32.mrf.mxu0  ;;  %v1382_v30 = vpop.f32.mrf.mxu1  ;;  %v338_v36 = vld [vmem:[%s3544_s16 + $0xd0] sm:$0xff]  ;;  %2131 = vmatpush.msra.mxu3 %v339_v15 }
 0x1b1   : > { %2669 = vst [vmem:[%s4324_s13] sm:$0xff] %v2541_v4  ;;  %v1354_v27 = vadd.f32 %v1353_v31, %v3747_v34  ;;  %v1383_v37 = vadd.f32 %v1382_v30, %v3749_v35  ;;  %2102 = vmatpush.msra.mxu2 %v338_v36 }
 0x1b2   : > { %2670 = vst [vmem:[%s4324_s13 + $0x8] sm:$0xff] %v2542_v7  ;;  %v2287_v51 = vadd.f32 %v4301_v14, %v1409_v57  ;;  %v2288_v28 = vadd.f32 %v4301_v14, %v1438_v50 }
 0x1b3   : > { %v2317_v32 = vadd.f32 %v4320_v29, %v1354_v27  ;;  %v2318_v33 = vadd.f32 %v4320_v29, %v1383_v37  ;;  %3135 = vmatmul.msk.f32.gmra.mxu0 %vm380_vm0, %v4043_v16  ;;  %3139 = vmatmul.msk.f32.gmra.mxu1 %vm380_vm0, %v4043_v16  ;;  %v4344_v27 = vpop.permute.xlu1 %2277 }
 0x1b4   : > { %v2415_v34 = vmul.f32 0.2, %v2287_v51  ;;  %v2416_v35 = vmul.f32 0.2, %v2288_v28  ;;  %3143 = vmatmul.msk.f32.gmra.mxu2 %vm380_vm0, %v4043_v16  ;;  %3147 = vmatmul.msk.f32.gmra.mxu3 %vm380_vm0, %v4043_v16 }
 0x1b5   : > { %v2445_v30 = vmul.f32 0.2, %v2317_v32  ;;  %v2446_v31 = vmul.f32 0.2, %v2318_v33 }
 0x1b6   : > { %v2543_v50 = vmax.f32 %v2287_v51, %v2415_v34  ;;  %v2544_v57 = vmax.f32 %v2288_v28, %v2416_v35 }
 0x1b7   : > { %v2573_v4 = vmax.f32 %v2317_v32, %v2445_v30  ;;  %v2574_v7 = vmax.f32 %v2318_v33, %v2446_v31  ;;  %v1411_v56 = vpop.f32.mrf.mxu2  ;;  %v1440_v37 = vpop.f32.mrf.mxu3 }
 0x1b8   : > { %2671 = vst [vmem:[%s4324_s13 + $0x10] sm:$0xff] %v2543_v50  ;;  %v1412_v26 = vadd.f32 %v1411_v56, %v3761_v38  ;;  %v1441_v25 = vadd.f32 %v1440_v37, %v3763_v39  ;;  %v1356_v24 = vpop.f32.mrf.mxu0  ;;  %v1385_v23 = vpop.f32.mrf.mxu1  ;;  %v336_v39 = vld [vmem:[%s3544_s16 + $0xc0] sm:$0xff] }
 0x1b9   : > { %2672 = vst [vmem:[%s4324_s13 + $0x18] sm:$0xff] %v2544_v57  ;;  %v1357_v36 = vadd.f32 %v1356_v24, %v3765_v40  ;;  %v1386_v51 = vadd.f32 %v1385_v23, %v3767_v41  ;;  %v337_v40 = vld [vmem:[%s3544_s16 + $0xc8] sm:$0xff]  ;;  %2044 = vmatpush.msra.mxu0 %v336_v39 }
 0x1ba   : > { %2701 = vst [vmem:[%s4324_s13 + $0x100] sm:$0xff] %v2573_v4  ;;  %v2319_v28 = vadd.f32 %v4320_v29, %v1412_v26  ;;  %v2320_v32 = vadd.f32 %v4320_v29, %v1441_v25  ;;  %2073 = vmatpush.msra.mxu1 %v337_v40 }
 0x1bb   : > { %2702 = vst [vmem:[%s4324_s13 + $0x108] sm:$0xff] %v2574_v7  ;;  %v2349_v33 = vadd.f32 %v4344_v27, %v1357_v36  ;;  %v2350_v38 = vadd.f32 %v4344_v27, %v1386_v51  ;;  %3136 = vmatmul.msk.f32.gmra.mxu0 %vm380_vm0, %v4066_v8  ;;  %3140 = vmatmul.msk.f32.gmra.mxu1 %vm380_vm0, %v4066_v8  ;;  %v4368_v34 = vpop.permute.xlu1 %2282 }
 0x1bc   : > { %v2447_v41 = vmul.f32 0.2, %v2319_v28  ;;  %v2448_v23 = vmul.f32 0.2, %v2320_v32  ;;  %3144 = vmatmul.msk.f32.gmra.mxu2 %vm380_vm0, %v4066_v8  ;;  %3148 = vmatmul.msk.f32.gmra.mxu3 %vm380_vm0, %v4066_v8 }
 0x1bd   : > { %v2477_v24 = vmul.f32 0.2, %v2349_v33  ;;  %v2478_v25 = vmul.f32 0.2, %v2350_v38 }
 0x1be   : > { %v2575_v26 = vmax.f32 %v2319_v28, %v2447_v41  ;;  %v2576_v15 = vmax.f32 %v2320_v32, %v2448_v23 }
 0x1bf   : > { %v2605_v35 = vmax.f32 %v2349_v33, %v2477_v24  ;;  %v2606_v30 = vmax.f32 %v2350_v38, %v2478_v25  ;;  %v1414_v31 = vpop.f32.mrf.mxu2  ;;  %v1443_v50 = vpop.f32.mrf.mxu3 }
 0x1c0   : > { %2703 = vst [vmem:[%s4324_s13 + $0x110] sm:$0xff] %v2575_v26  ;;  %v1415_v57 = vadd.f32 %v1414_v31, %v3777_v42  ;;  %v1444_v4 = vadd.f32 %v1443_v50, %v3779_v43  ;;  %v1359_v7 = vpop.f32.mrf.mxu0  ;;  %v1388_v56 = vpop.f32.mrf.mxu1 }
 0x1c1   : > { %2704 = vst [vmem:[%s4324_s13 + $0x118] sm:$0xff] %v2576_v15  ;;  %v1360_v37 = vadd.f32 %v1359_v7, %v3781_v44  ;;  %v1389_v36 = vadd.f32 %v1388_v56, %v3783_v45 }
 0x1c2   : > { %2733 = vst [vmem:[%s4324_s13 + $0x200] sm:$0xff] %v2605_v35  ;;  %v2351_v51 = vadd.f32 %v4344_v27, %v1415_v57  ;;  %v2352_v28 = vadd.f32 %v4344_v27, %v1444_v4 }
 0x1c3   : > { %2734 = vst [vmem:[%s4324_s13 + $0x208] sm:$0xff] %v2606_v30  ;;  %v2381_v32 = vadd.f32 %v4368_v34, %v1360_v37  ;;  %v2382_v42 = vadd.f32 %v4368_v34, %v1389_v36  ;;  %3137 = vmatmul.msk.f32.gmra.mxu0 %vm380_vm0, %v4087_v17  ;;  %3141 = vmatmul.msk.f32.gmra.mxu1 %vm380_vm0, %v4087_v17 }
 0x1c4   : > { %v2479_v43 = vmul.f32 0.2, %v2351_v51  ;;  %v2480_v44 = vmul.f32 0.2, %v2352_v28  ;;  %3145 = vmatmul.msk.f32.gmra.mxu2 %vm380_vm0, %v4087_v17  ;;  %3149 = vmatmul.msk.f32.gmra.mxu3 %vm380_vm0, %v4087_v17 }
 0x1c5   : > { %v2509_v45 = vmul.f32 0.2, %v2381_v32  ;;  %v2510_v33 = vmul.f32 0.2, %v2382_v42 }
 0x1c6   : > { %v2607_v38 = vmax.f32 %v2351_v51, %v2479_v43  ;;  %v2608_v39 = vmax.f32 %v2352_v28, %v2480_v44 }
 0x1c7   : > { %v2637_v40 = vmax.f32 %v2381_v32, %v2509_v45  ;;  %v2638_v41 = vmax.f32 %v2382_v42, %v2510_v33  ;;  %v1417_v23 = vpop.f32.mrf.mxu2  ;;  %v1446_v24 = vpop.f32.mrf.mxu3 }
 0x1c8   : > { %2735 = vst [vmem:[%s4324_s13 + $0x210] sm:$0xff] %v2607_v38  ;;  %v1418_v25 = vadd.f32 %v1417_v23, %v3793_v46  ;;  %v1447_v26 = vadd.f32 %v1446_v24, %v3795_v47  ;;  %v1466_v15 = vpop.f32.mrf.mxu0  ;;  %v1495_v35 = vpop.f32.mrf.mxu1 }
 0x1c9   : > { %2736 = vst [vmem:[%s4324_s13 + $0x218] sm:$0xff] %v2608_v39  ;;  %v1467_v30 = vadd.f32 %v1466_v15, %v3797_v48  ;;  %v1496_v31 = vadd.f32 %v1495_v35, %v3799_v49 }
 0x1ca   : > { %2765 = vst [vmem:[%s4324_s13 + $0x300] sm:$0xff] %v2637_v40  ;;  %v2383_v50 = vadd.f32 %v4368_v34, %v1418_v25  ;;  %v2384_v57 = vadd.f32 %v4368_v34, %v1447_v26 }
 0x1cb   : > { %2766 = vst [vmem:[%s4324_s13 + $0x308] sm:$0xff] %v2638_v41  ;;  %v2289_v4 = vadd.f32 %v4301_v14, %v1467_v30  ;;  %v2290_v46 = vadd.f32 %v4301_v14, %v1496_v31  ;;  %3150 = vmatmul.msk.f32.vlgmr.msrb.gmra.mxu0 %vm380_vm0, %v4017_v13  ;;  %3154 = vmatmul.msk.f32.vlgmr.msrb.gmra.mxu1 %vm380_vm0, %v4017_v13 }
 0x1cc   : > { %v2511_v47 = vmul.f32 0.2, %v2383_v50  ;;  %v2512_v48 = vmul.f32 0.2, %v2384_v57  ;;  %3158 = vmatmul.msk.f32.vlgmr.msrb.gmra.mxu2 %vm380_vm0, %v4017_v13  ;;  %3162 = vmatmul.msk.f32.vlgmr.msrb.gmra.mxu3 %vm380_vm0, %v4017_v13 }
 0x1cd   : > { %v2417_v49 = vmul.f32 0.2, %v2289_v4  ;;  %v2418_v7 = vmul.f32 0.2, %v2290_v46 }
 0x1ce   : > { %v2639_v56 = vmax.f32 %v2383_v50, %v2511_v47  ;;  %v2640_v37 = vmax.f32 %v2384_v57, %v2512_v48 }
 0x1cf   : > { %v2545_v36 = vmax.f32 %v2289_v4, %v2417_v49  ;;  %v2546_v51 = vmax.f32 %v2290_v46, %v2418_v7  ;;  %v1524_v28 = vpop.f32.mrf.mxu2  ;;  %v1553_v32 = vpop.f32.mrf.mxu3 }
 0x1d0   : > { %2767 = vst [vmem:[%s4324_s13 + $0x310] sm:$0xff] %v2639_v56  ;;  %v1525_v42 = vadd.f32 %v1524_v28, %v3811_v52  ;;  %v1554_v43 = vadd.f32 %v1553_v32, %v3813_v53  ;;  %v1469_v44 = vpop.f32.mrf.mxu0  ;;  %v1498_v45 = vpop.f32.mrf.mxu1  ;;  %v342_v53 = vld [vmem:[%s3544_s16 + $0xf0] sm:$0xff] }
 0x1d1   : > { %2768 = vst [vmem:[%s4324_s13 + $0x318] sm:$0xff] %v2640_v37  ;;  %v1470_v33 = vadd.f32 %v1469_v44, %v3815_v54  ;;  %v1499_v38 = vadd.f32 %v1498_v45, %v3817_v55  ;;  %v343_v54 = vld [vmem:[%s3544_s16 + $0xf8] sm:$0xff]  ;;  %2218 = vmatpush.msrb.mxu2 %v342_v53 }
 0x1d2   : > { %2673 = vst [vmem:[%s4324_s13 + $0x20] sm:$0xff] %v2545_v36  ;;  %v2291_v39 = vadd.f32 %v4301_v14, %v1525_v42  ;;  %v2292_v40 = vadd.f32 %v4301_v14, %v1554_v43  ;;  %2247 = vmatpush.msrb.mxu3 %v343_v54 }
 0x1d3   : > { %2674 = vst [vmem:[%s4324_s13 + $0x28] sm:$0xff] %v2546_v51  ;;  %v2321_v41 = vadd.f32 %v4320_v29, %v1470_v33  ;;  %v2322_v52 = vadd.f32 %v4320_v29, %v1499_v38  ;;  %3151 = vmatmul.msk.f32.gmra.mxu0 %vm380_vm0, %v4043_v16  ;;  %3155 = vmatmul.msk.f32.gmra.mxu1 %vm380_vm0, %v4043_v16 }
 0x1d4   : > { %v2419_v55 = vmul.f32 0.2, %v2291_v39  ;;  %v2420_v23 = vmul.f32 0.2, %v2292_v40  ;;  %3159 = vmatmul.msk.f32.gmra.mxu2 %vm380_vm0, %v4043_v16  ;;  %3163 = vmatmul.msk.f32.gmra.mxu3 %vm380_vm0, %v4043_v16 }
 0x1d5   : > { %v2449_v24 = vmul.f32 0.2, %v2321_v41  ;;  %v2450_v25 = vmul.f32 0.2, %v2322_v52 }
 0x1d6   : > { %v2547_v26 = vmax.f32 %v2291_v39, %v2419_v55  ;;  %v2548_v15 = vmax.f32 %v2292_v40, %v2420_v23 }
 0x1d7   : > { %v2577_v35 = vmax.f32 %v2321_v41, %v2449_v24  ;;  %v2578_v30 = vmax.f32 %v2322_v52, %v2450_v25  ;;  %v1527_v31 = vpop.f32.mrf.mxu2  ;;  %v1556_v50 = vpop.f32.mrf.mxu3 }
 0x1d8   : > { %2675 = vst [vmem:[%s4324_s13 + $0x30] sm:$0xff] %v2547_v26  ;;  %v1528_v57 = vadd.f32 %v1527_v31, %v3829_v58  ;;  %v1557_v4 = vadd.f32 %v1556_v50, %v3831_v59  ;;  %v1472_v46 = vpop.f32.mrf.mxu0  ;;  %v1501_v47 = vpop.f32.mrf.mxu1  ;;  %v340_v59 = vld [vmem:[%s3544_s16 + $0xe0] sm:$0xff] }
 0x1d9   : > { %2676 = vst [vmem:[%s4324_s13 + $0x38] sm:$0xff] %v2548_v15  ;;  %v1473_v48 = vadd.f32 %v1472_v46, %v3833_v60  ;;  %v1502_v49 = vadd.f32 %v1501_v47, %v3835_v61  ;;  %v341_v60 = vld [vmem:[%s3544_s16 + $0xe8] sm:$0xff]  ;;  %2160 = vmatpush.msrb.mxu0 %v340_v59  ;;  %s3358_s16 = scalar_lea.hbm %s3357_s12, 1024 }
 0x1da   : > { %2705 = vst [vmem:[%s4324_s13 + $0x120] sm:$0xff] %v2577_v35  ;;  %v2323_v7 = vadd.f32 %v4320_v29, %v1528_v57  ;;  %v2324_v56 = vadd.f32 %v4320_v29, %v1557_v4  ;;  %2189 = vmatpush.msrb.mxu1 %v341_v60  ;;  %p3359_p4 = scmp.ne.s32.totalorder %s3357_s12, %s3358_s16  ;;  %p3364_p8 = scmp.lt.s32.totalorder %s3362_s26, %s3358_s16 }
 0x1db   : > { %2706 = vst [vmem:[%s4324_s13 + $0x128] sm:$0xff] %v2578_v30  ;;  %v2353_v37 = vadd.f32 %v4344_v27, %v1473_v48  ;;  %v2354_v58 = vadd.f32 %v4344_v27, %v1502_v49  ;;  %3152 = vmatmul.msk.f32.gmra.mxu0 %vm380_vm0, %v4066_v8  ;;  %3156 = vmatmul.msk.f32.gmra.mxu1 %vm380_vm0, %v4066_v8 }
 0x1dc   : > { %v2451_v61 = vmul.f32 0.2, %v2323_v7  ;;  %v2452_v36 = vmul.f32 0.2, %v2324_v56  ;;  %3160 = vmatmul.msk.f32.gmra.mxu2 %vm380_vm0, %v4066_v8  ;;  %3164 = vmatmul.msk.f32.gmra.mxu3 %vm380_vm0, %v4066_v8  ;;  %p3360_p5 = pnand %p3359_p4, %p3514_p9  ;;  %p3365_p10 = por %p3364_p8, %p3363_p7 }
 0x1dd   : > { %v2481_v51 = vmul.f32 0.2, %v2353_v37  ;;  %v2482_v28 = vmul.f32 0.2, %v2354_v58 }
 0x1de   : > { %v2579_v32 = vmax.f32 %v2323_v7, %v2451_v61  ;;  %v2580_v42 = vmax.f32 %v2324_v56, %v2452_v36  ;;  %p3361_p6 = pneg %p3360_p5 }
 0x1df   : > { %v2609_v43 = vmax.f32 %v2353_v37, %v2481_v51  ;;  %v2610_v44 = vmax.f32 %v2354_v58, %v2482_v28  ;;  %v1530_v45 = vpop.f32.mrf.mxu2  ;;  %v1559_v33 = vpop.f32.mrf.mxu3 }
 0x1e0   : > { %2707 = vst [vmem:[%s4324_s13 + $0x130] sm:$0xff] %v2579_v32  ;;  %v1531_v38 = vadd.f32 %v1530_v45, %v3845_v62  ;;  %v1560_v39 = vadd.f32 %v1559_v33, %v3847_v63  ;;  %v1475_v40 = vpop.f32.mrf.mxu0  ;;  %v1504_v41 = vpop.f32.mrf.mxu1  ;;  %p3366_p13 = pnand %p3365_p10, %p3361_p6 }
 0x1e1   : > { %2708 = vst [vmem:[%s4324_s13 + $0x138] sm:$0xff] %v2580_v42  ;;  %v1476_v52 = vadd.f32 %v1475_v40, %v3849_v0  ;;  %v1505_v53 = vadd.f32 %v1504_v41, %v3851_v1 }
 0x1e2   : > { %2737 = vst [vmem:[%s4324_s13 + $0x220] sm:$0xff] %v2609_v43  ;;  %v2355_v54 = vadd.f32 %v4344_v27, %v1531_v38  ;;  %v2356_v55 = vadd.f32 %v4344_v27, %v1560_v39 }
 0x1e3   : > { %2738 = vst [vmem:[%s4324_s13 + $0x228] sm:$0xff] %v2610_v44  ;;  %v2385_v23 = vadd.f32 %v4368_v34, %v1476_v52  ;;  %v2386_v62 = vadd.f32 %v4368_v34, %v1505_v53  ;;  %3153 = vmatmul.msk.f32.gmra.mxu0 %vm380_vm0, %v4087_v17  ;;  %3157 = vmatmul.msk.f32.gmra.mxu1 %vm380_vm0, %v4087_v17 }
 0x1e4   : > { %v2483_v63 = vmul.f32 0.2, %v2355_v54  ;;  %v2484_v0 = vmul.f32 0.2, %v2356_v55  ;;  %3161 = vmatmul.msk.f32.gmra.mxu2 %vm380_vm0, %v4087_v17  ;;  %3165 = vmatmul.msk.f32.gmra.mxu3 %vm380_vm0, %v4087_v17 }
 0x1e5   : > { %v2513_v1 = vmul.f32 0.2, %v2385_v23  ;;  %v2514_v24 = vmul.f32 0.2, %v2386_v62 }
 0x1e6   : > { %v2611_v25 = vmax.f32 %v2355_v54, %v2483_v63  ;;  %v2612_v26 = vmax.f32 %v2356_v55, %v2484_v0 }
 0x1e7   : > { %v2641_v15 = vmax.f32 %v2385_v23, %v2513_v1  ;;  %v2642_v35 = vmax.f32 %v2386_v62, %v2514_v24  ;;  %v1533_v30 = vpop.f32.mrf.mxu2  ;;  %v1562_v31 = vpop.f32.mrf.mxu3 }
 0x1e8   : > { %2739 = vst [vmem:[%s4324_s13 + $0x230] sm:$0xff] %v2611_v25  ;;  %v1534_v50 = vadd.f32 %v1533_v30, %v3861_v2  ;;  %v1563_v57 = vadd.f32 %v1562_v31, %v3863_v3  ;;  %v1582_v4 = vpop.f32.mrf.mxu0  ;;  %v1611_v46 = vpop.f32.mrf.mxu1 }
 0x1e9   : > { %2740 = vst [vmem:[%s4324_s13 + $0x238] sm:$0xff] %v2612_v26  ;;  %v1583_v47 = vadd.f32 %v1582_v4, %v3865_v5  ;;  %v1612_v48 = vadd.f32 %v1611_v46, %v3867_v6 }
 0x1ea   : > { %2769 = vst [vmem:[%s4324_s13 + $0x320] sm:$0xff] %v2641_v15  ;;  %v2387_v49 = vadd.f32 %v4368_v34, %v1534_v50  ;;  %v2388_v7 = vadd.f32 %v4368_v34, %v1563_v57 }
 0x1eb   : > { %2770 = vst [vmem:[%s4324_s13 + $0x328] sm:$0xff] %v2642_v35  ;;  %v2293_v56 = vadd.f32 %v4301_v14, %v1583_v47  ;;  %v2294_v2 = vadd.f32 %v4301_v14, %v1612_v48  ;;  %3166 = vmatmul.msk.f32.vlgmr.msra.gmra.mxu0 %vm380_vm0, %v4017_v13  ;;  %3170 = vmatmul.msk.f32.vlgmr.msra.gmra.mxu1 %vm380_vm0, %v4017_v13  ;;  %v4970_v47 = vld [vmem:[#allocation13_spill] sm:$0xff] }
 0x1ec   : > { %v2515_v3 = vmul.f32 0.2, %v2387_v49  ;;  %v2516_v5 = vmul.f32 0.2, %v2388_v7  ;;  %3174 = vmatmul.msk.f32.vlgmr.msra.gmra.mxu2 %vm380_vm0, %v4017_v13  ;;  %3178 = vmatmul.msk.f32.vlgmr.msra.gmra.mxu3 %vm380_vm0, %v4017_v13 }
 0x1ed   : > { %v2421_v6 = vmul.f32 0.2, %v2293_v56  ;;  %v2422_v37 = vmul.f32 0.2, %v2294_v2 }
 0x1ee   : > { %v2643_v58 = vmax.f32 %v2387_v49, %v2515_v3  ;;  %v2644_v59 = vmax.f32 %v2388_v7, %v2516_v5 }
 0x1ef   : > { %v2549_v60 = vmax.f32 %v2293_v56, %v2421_v6  ;;  %v2550_v61 = vmax.f32 %v2294_v2, %v2422_v37  ;;  %v1640_v36 = vpop.f32.mrf.mxu2  ;;  %v1669_v51 = vpop.f32.mrf.mxu3  ;;  %v4971_v56 = vld [vmem:[#allocation14_spill] sm:$0xff]  ;;  %v4972_v2 = vld [vmem:[#allocation15_spill] sm:$0xff] }
 0x1f0   : > { %2771 = vst [vmem:[%s4324_s13 + $0x330] sm:$0xff] %v2643_v58  ;;  %v1641_v28 = vadd.f32 %v1640_v36, %v3879_v9  ;;  %v1670_v32 = vadd.f32 %v1669_v51, %v3881_v10  ;;  %v1585_v42 = vpop.f32.mrf.mxu0  ;;  %v1614_v43 = vpop.f32.mrf.mxu1 }
 0x1f1   : > { %2772 = vst [vmem:[%s4324_s13 + $0x338] sm:$0xff] %v2644_v59  ;;  %v1586_v13 = vadd.f32 %v1585_v42, %v3883_v11  ;;  %v1615_v44 = vadd.f32 %v1614_v43, %v3885_v12 }
 0x1f2   : > { %2677 = vst [vmem:[%s4324_s13 + $0x40] sm:$0xff] %v2549_v60  ;;  %v2295_v45 = vadd.f32 %v4301_v14, %v1641_v28  ;;  %v2296_v33 = vadd.f32 %v4301_v14, %v1670_v32 }
 0x1f3   : > { %2678 = vst [vmem:[%s4324_s13 + $0x48] sm:$0xff] %v2550_v61  ;;  %v2325_v38 = vadd.f32 %v4320_v29, %v1586_v13  ;;  %v2326_v9 = vadd.f32 %v4320_v29, %v1615_v44  ;;  %3167 = vmatmul.msk.f32.gmra.mxu0 %vm380_vm0, %v4043_v16  ;;  %3171 = vmatmul.msk.f32.gmra.mxu1 %vm380_vm0, %v4043_v16  ;;  %v4973_v13 = vld [vmem:[#allocation16_spill] sm:$0xff] }
 0x1f4   : > { %v2423_v10 = vmul.f32 0.2, %v2295_v45  ;;  %v2424_v11 = vmul.f32 0.2, %v2296_v33  ;;  %3175 = vmatmul.msk.f32.gmra.mxu2 %vm380_vm0, %v4043_v16  ;;  %3179 = vmatmul.msk.f32.gmra.mxu3 %vm380_vm0, %v4043_v16 }
 0x1f5   : > { %v2453_v12 = vmul.f32 0.2, %v2325_v38  ;;  %v2454_v39 = vmul.f32 0.2, %v2326_v9 }
 0x1f6   : > { %v2551_v40 = vmax.f32 %v2295_v45, %v2423_v10  ;;  %v2552_v41 = vmax.f32 %v2296_v33, %v2424_v11  ;;  %v4974_v45 = vld [vmem:[#allocation17_spill] sm:$0xff]  ;;  %v4975_v10 = vld [vmem:[#allocation18_spill] sm:$0xff]  ;;  %v4976_v11 = vld [vmem:[#allocation19_spill] sm:$0xff] }
 0x1f7   : > { %v2581_v52 = vmax.f32 %v2325_v38, %v2453_v12  ;;  %v2582_v53 = vmax.f32 %v2326_v9, %v2454_v39  ;;  %v1643_v54 = vpop.f32.mrf.mxu2  ;;  %v1672_v55 = vpop.f32.mrf.mxu3 }
 0x1f8   : > { %2679 = vst [vmem:[%s4324_s13 + $0x50] sm:$0xff] %v2551_v40  ;;  %v1644_v23 = vadd.f32 %v1643_v54, %v3897_v18  ;;  %v1673_v62 = vadd.f32 %v1672_v55, %v3899_v19  ;;  %v1588_v63 = vpop.f32.mrf.mxu0  ;;  %v1617_v0 = vpop.f32.mrf.mxu1 }
 0x1f9   : > { %2680 = vst [vmem:[%s4324_s13 + $0x58] sm:$0xff] %v2552_v41  ;;  %v1589_v16 = vadd.f32 %v1588_v63, %v3901_v20  ;;  %v1618_v1 = vadd.f32 %v1617_v0, %v3903_v21 }
 0x1fa   : > { %2709 = vst [vmem:[%s4324_s13 + $0x140] sm:$0xff] %v2581_v52  ;;  %v2327_v24 = vadd.f32 %v4320_v29, %v1644_v23  ;;  %v2328_v25 = vadd.f32 %v4320_v29, %v1673_v62 }
 0x1fb   : > { %2710 = vst [vmem:[%s4324_s13 + $0x148] sm:$0xff] %v2582_v53  ;;  %v2357_v26 = vadd.f32 %v4344_v27, %v1589_v16  ;;  %v2358_v18 = vadd.f32 %v4344_v27, %v1618_v1  ;;  %3168 = vmatmul.msk.f32.gmra.mxu0 %vm380_vm0, %v4066_v8  ;;  %3172 = vmatmul.msk.f32.gmra.mxu1 %vm380_vm0, %v4066_v8  ;;  %v3278_v53 = vld [vmem:[%s4871_s0] sm:$0xff] }
 0x1fc   : > { %v2455_v19 = vmul.f32 0.2, %v2327_v24  ;;  %v2456_v20 = vmul.f32 0.2, %v2328_v25  ;;  %3176 = vmatmul.msk.f32.gmra.mxu2 %vm380_vm0, %v4066_v8  ;;  %3180 = vmatmul.msk.f32.gmra.mxu3 %vm380_vm0, %v4066_v8 }
 0x1fd   : > { %v2485_v21 = vmul.f32 0.2, %v2357_v26  ;;  %v2486_v15 = vmul.f32 0.2, %v2358_v18 }
 0x1fe   : > { %v2583_v35 = vmax.f32 %v2327_v24, %v2455_v19  ;;  %v2584_v30 = vmax.f32 %v2328_v25, %v2456_v20  ;;  %v4978_v19 = vld [vmem:[#allocation21_spill] sm:$0xff] }
 0x1ff   : > { %v2613_v31 = vmax.f32 %v2357_v26, %v2485_v21  ;;  %v2614_v50 = vmax.f32 %v2358_v18, %v2486_v15  ;;  %v1646_v57 = vpop.f32.mrf.mxu2  ;;  %v1675_v4 = vpop.f32.mrf.mxu3  ;;  %v4977_v26 = vld [vmem:[#allocation20_spill] sm:$0xff] }
 0x200   : > { %2711 = vst [vmem:[%s4324_s13 + $0x150] sm:$0xff] %v2583_v35  ;;  %v1647_v46 = vadd.f32 %v1646_v57, %v3913_v22  ;;  %v1676_v48 = vadd.f32 %v1675_v4, %v4970_v47  ;;  %v1591_v49 = vpop.f32.mrf.mxu0  ;;  %v1620_v7 = vpop.f32.mrf.mxu1  ;;  %v4979_v35 = vld [vmem:[#allocation22_spill] sm:$0xff] }
 0x201   : > { %2712 = vst [vmem:[%s4324_s13 + $0x158] sm:$0xff] %v2584_v30  ;;  %v1592_v8 = vadd.f32 %v1591_v49, %v4971_v56  ;;  %v1621_v3 = vadd.f32 %v1620_v7, %v4972_v2 }
 0x202   : > { %2741 = vst [vmem:[%s4324_s13 + $0x240] sm:$0xff] %v2613_v31  ;;  %v2359_v5 = vadd.f32 %v4344_v27, %v1647_v46  ;;  %v2360_v6 = vadd.f32 %v4344_v27, %v1676_v48  ;;  %v4980_v31 = vld [vmem:[#allocation23_spill] sm:$0xff]  ;;  %v3279_v48 = vld [vmem:[%s4871_s0 + $0x8] sm:$0xff] }
 0x203   : > { %2742 = vst [vmem:[%s4324_s13 + $0x248] sm:$0xff] %v2614_v50  ;;  %v2389_v37 = vadd.f32 %v4368_v34, %v1592_v8  ;;  %v2390_v22 = vadd.f32 %v4368_v34, %v1621_v3  ;;  %3169 = vmatmul.msk.f32.gmra.mxu0 %vm380_vm0, %v4087_v17  ;;  %3173 = vmatmul.msk.f32.gmra.mxu1 %vm380_vm0, %v4087_v17 }
 0x204   : > { %v2487_v58 = vmul.f32 0.2, %v2359_v5  ;;  %v2488_v59 = vmul.f32 0.2, %v2360_v6  ;;  %3177 = vmatmul.msk.f32.gmra.mxu2 %vm380_vm0, %v4087_v17  ;;  %3181 = vmatmul.msk.f32.gmra.mxu3 %vm380_vm0, %v4087_v17 }
 0x205   : > { %v2517_v60 = vmul.f32 0.2, %v2389_v37  ;;  %v2518_v61 = vmul.f32 0.2, %v2390_v22 }
 0x206   : > { %v2615_v36 = vmax.f32 %v2359_v5, %v2487_v58  ;;  %v2616_v51 = vmax.f32 %v2360_v6, %v2488_v59  ;;  %v4981_v58 = vld [vmem:[#allocation24_spill] sm:$0xff] }
 0x207   : > { %v2645_v28 = vmax.f32 %v2389_v37, %v2517_v60  ;;  %v2646_v32 = vmax.f32 %v2390_v22, %v2518_v61  ;;  %v1649_v42 = vpop.f32.mrf.mxu2  ;;  %v1678_v43 = vpop.f32.mrf.mxu3  ;;  %v4982_v60 = vld [vmem:[#allocation25_spill] sm:$0xff] }
 0x208   : > { %2743 = vst [vmem:[%s4324_s13 + $0x250] sm:$0xff] %v2615_v36  ;;  %v1650_v44 = vadd.f32 %v1649_v42, %v4973_v13  ;;  %v1679_v33 = vadd.f32 %v1678_v43, %v4974_v45  ;;  %v1698_v38 = vpop.f32.mrf.mxu0  ;;  %v1727_v9 = vpop.f32.mrf.mxu1  ;;  %v4984_v42 = vld [vmem:[#allocation27_spill] sm:$0xff] }
 0x209   : > { %2744 = vst [vmem:[%s4324_s13 + $0x258] sm:$0xff] %v2616_v51  ;;  %v1699_v17 = vadd.f32 %v1698_v38, %v4975_v10  ;;  %v1728_v12 = vadd.f32 %v1727_v9, %v4976_v11  ;;  %v3280_v38 = vld [vmem:[%s4871_s0 + $0x10] sm:$0xff] }
 0x20a   : > { %2773 = vst [vmem:[%s4324_s13 + $0x340] sm:$0xff] %v2645_v28  ;;  %v2391_v39 = vadd.f32 %v4368_v34, %v1650_v44  ;;  %v2392_v40 = vadd.f32 %v4368_v34, %v1679_v33  ;;  %v4983_v28 = vld [vmem:[#allocation26_spill] sm:$0xff] }
 0x20b   : > { %2774 = vst [vmem:[%s4324_s13 + $0x348] sm:$0xff] %v2646_v32  ;;  %v2297_v41 = vadd.f32 %v4301_v14, %v1699_v17  ;;  %v2298_v52 = vadd.f32 %v4301_v14, %v1728_v12  ;;  %3182 = vmatmul.msk.f32.vlgmr.msrb.gmra.mxu0 %vm380_vm0, %v3278_v53  ;;  %3186 = vmatmul.msk.f32.vlgmr.msrb.gmra.mxu1 %vm380_vm0, %v3278_v53 }
 0x20c   : > { %v2519_v54 = vmul.f32 0.2, %v2391_v39  ;;  %v2520_v55 = vmul.f32 0.2, %v2392_v40  ;;  %3190 = vmatmul.msk.f32.vlgmr.msrb.gmra.mxu2 %vm380_vm0, %v3278_v53  ;;  %3194 = vmatmul.msk.f32.vlgmr.msrb.gmra.mxu3 %vm380_vm0, %v3278_v53 }
 0x20d   : > { %v2425_v23 = vmul.f32 0.2, %v2297_v41  ;;  %v2426_v62 = vmul.f32 0.2, %v2298_v52 }
 0x20e   : > { %v2647_v63 = vmax.f32 %v2391_v39, %v2519_v54  ;;  %v2648_v0 = vmax.f32 %v2392_v40, %v2520_v55  ;;  %v4985_v54 = vld [vmem:[#allocation28_spill] sm:$0xff] }
 0x20f   : > { %v2553_v16 = vmax.f32 %v2297_v41, %v2425_v23  ;;  %v2554_v1 = vmax.f32 %v2298_v52, %v2426_v62  ;;  %v1756_v24 = vpop.f32.mrf.mxu2  ;;  %v1785_v25 = vpop.f32.mrf.mxu3  ;;  %v4986_v23 = vld [vmem:[#allocation29_spill] sm:$0xff] }
 0x210   : > { %2775 = vst [vmem:[%s4324_s13 + $0x350] sm:$0xff] %v2647_v63  ;;  %v1757_v18 = vadd.f32 %v1756_v24, %v4977_v26  ;;  %v1786_v20 = vadd.f32 %v1785_v25, %v4978_v19  ;;  %v1701_v21 = vpop.f32.mrf.mxu0  ;;  %v1730_v15 = vpop.f32.mrf.mxu1  ;;  %v4988_v24 = vld [vmem:[#allocation31_spill] sm:$0xff] }
 0x211   : > { %2776 = vst [vmem:[%s4324_s13 + $0x358] sm:$0xff] %v2648_v0  ;;  %v1702_v30 = vadd.f32 %v1701_v21, %v4979_v35  ;;  %v1731_v50 = vadd.f32 %v1730_v15, %v4980_v31  ;;  %v3281_v21 = vld [vmem:[%s4871_s0 + $0x18] sm:$0xff] }
 0x212   : > { %2681 = vst [vmem:[%s4324_s13 + $0x60] sm:$0xff] %v2553_v16  ;;  %v2299_v57 = vadd.f32 %v4301_v14, %v1757_v18  ;;  %v2300_v4 = vadd.f32 %v4301_v14, %v1786_v20  ;;  %v4987_v16 = vld [vmem:[#allocation30_spill] sm:$0xff] }
 0x213   : > { %2682 = vst [vmem:[%s4324_s13 + $0x68] sm:$0xff] %v2554_v1  ;;  %v2329_v46 = vadd.f32 %v4320_v29, %v1702_v30  ;;  %v2330_v47 = vadd.f32 %v4320_v29, %v1731_v50  ;;  %3183 = vmatmul.msk.f32.gmra.mxu0 %vm380_vm0, %v3279_v48  ;;  %3187 = vmatmul.msk.f32.gmra.mxu1 %vm380_vm0, %v3279_v48 }
 0x214   : > { %v2427_v49 = vmul.f32 0.2, %v2299_v57  ;;  %v2428_v7 = vmul.f32 0.2, %v2300_v4  ;;  %3191 = vmatmul.msk.f32.gmra.mxu2 %vm380_vm0, %v3279_v48  ;;  %3195 = vmatmul.msk.f32.gmra.mxu3 %vm380_vm0, %v3279_v48 }
 0x215   : > { %v2457_v56 = vmul.f32 0.2, %v2329_v46  ;;  %v2458_v8 = vmul.f32 0.2, %v2330_v47 }
 0x216   : > { %v2555_v2 = vmax.f32 %v2299_v57, %v2427_v49  ;;  %v2556_v3 = vmax.f32 %v2300_v4, %v2428_v7  ;;  %v4989_v49 = vld [vmem:[#allocation32_spill] sm:$0xff] }
 0x217   : > { %v2585_v5 = vmax.f32 %v2329_v46, %v2457_v56  ;;  %v2586_v6 = vmax.f32 %v2330_v47, %v2458_v8  ;;  %v1759_v37 = vpop.f32.mrf.mxu2  ;;  %v1788_v22 = vpop.f32.mrf.mxu3  ;;  %v4990_v56 = vld [vmem:[#allocation33_spill] sm:$0xff] }
 0x218   : > { %2683 = vst [vmem:[%s4324_s13 + $0x70] sm:$0xff] %v2555_v2  ;;  %v1760_v59 = vadd.f32 %v1759_v37, %v4981_v58  ;;  %v1789_v61 = vadd.f32 %v1788_v22, %v4982_v60  ;;  %v1704_v36 = vpop.f32.mrf.mxu0  ;;  %v1733_v51 = vpop.f32.mrf.mxu1  ;;  %v4992_v37 = vld [vmem:[#allocation35_spill] sm:$0xff] }
 0x219   : > { %2684 = vst [vmem:[%s4324_s13 + $0x78] sm:$0xff] %v2556_v3  ;;  %v1705_v32 = vadd.f32 %v1704_v36, %v4983_v28  ;;  %v1734_v43 = vadd.f32 %v1733_v51, %v4984_v42 }
 0x21a   : > { %2713 = vst [vmem:[%s4324_s13 + $0x160] sm:$0xff] %v2585_v5  ;;  %v2331_v13 = vadd.f32 %v4320_v29, %v1760_v59  ;;  %v2332_v44 = vadd.f32 %v4320_v29, %v1789_v61  ;;  %v4991_v5 = vld [vmem:[#allocation34_spill] sm:$0xff] }
 0x21b   : > { %2714 = vst [vmem:[%s4324_s13 + $0x168] sm:$0xff] %v2586_v6  ;;  %v2361_v45 = vadd.f32 %v4344_v27, %v1705_v32  ;;  %v2362_v33 = vadd.f32 %v4344_v27, %v1734_v43  ;;  %3184 = vmatmul.msk.f32.gmra.mxu0 %vm380_vm0, %v3280_v38  ;;  %3188 = vmatmul.msk.f32.gmra.mxu1 %vm380_vm0, %v3280_v38 }
 0x21c   : > { %v2459_v9 = vmul.f32 0.2, %v2331_v13  ;;  %v2460_v10 = vmul.f32 0.2, %v2332_v44  ;;  %3192 = vmatmul.msk.f32.gmra.mxu2 %vm380_vm0, %v3280_v38  ;;  %3196 = vmatmul.msk.f32.gmra.mxu3 %vm380_vm0, %v3280_v38  ;;  %v4993_v38 = vld [vmem:[#allocation36_spill] sm:$0xff] }
 0x21d   : > { %v2489_v17 = vmul.f32 0.2, %v2361_v45  ;;  %v2490_v11 = vmul.f32 0.2, %v2362_v33 }
 0x21e   : > { %v2587_v12 = vmax.f32 %v2331_v13, %v2459_v9  ;;  %v2588_v39 = vmax.f32 %v2332_v44, %v2460_v10  ;;  %v4994_v10 = vld [vmem:[#allocation37_spill] sm:$0xff] }
 0x21f   : > { %v2617_v40 = vmax.f32 %v2361_v45, %v2489_v17  ;;  %v2618_v41 = vmax.f32 %v2362_v33, %v2490_v11  ;;  %v1762_v52 = vpop.f32.mrf.mxu2  ;;  %v1791_v53 = vpop.f32.mrf.mxu3 }
 0x220   : > { %2715 = vst [vmem:[%s4324_s13 + $0x170] sm:$0xff] %v2587_v12  ;;  %v1763_v55 = vadd.f32 %v1762_v52, %v4985_v54  ;;  %v1792_v62 = vadd.f32 %v1791_v53, %v4986_v23  ;;  %v1707_v63 = vpop.f32.mrf.mxu0  ;;  %v1736_v0 = vpop.f32.mrf.mxu1 }
 0x221   : > { %2716 = vst [vmem:[%s4324_s13 + $0x178] sm:$0xff] %v2588_v39  ;;  %v1708_v1 = vadd.f32 %v1707_v63, %v4987_v16  ;;  %v1737_v25 = vadd.f32 %v1736_v0, %v4988_v24  ;;  %v4995_v39 = vld [vmem:[#allocation38_spill] sm:$0xff] }
 0x222   : > { %2745 = vst [vmem:[%s4324_s13 + $0x260] sm:$0xff] %v2617_v40  ;;  %v2363_v26 = vadd.f32 %v4344_v27, %v1763_v55  ;;  %v2364_v18 = vadd.f32 %v4344_v27, %v1792_v62 }
 0x223   : > { %2746 = vst [vmem:[%s4324_s13 + $0x268] sm:$0xff] %v2618_v41  ;;  %v2393_v19 = vadd.f32 %v4368_v34, %v1708_v1  ;;  %v2394_v20 = vadd.f32 %v4368_v34, %v1737_v25  ;;  %3185 = vmatmul.msk.f32.gmra.mxu0 %vm380_vm0, %v3281_v21  ;;  %3189 = vmatmul.msk.f32.gmra.mxu1 %vm380_vm0, %v3281_v21  ;;  %v4996_v41 = vld [vmem:[#allocation39_spill] sm:$0xff] }
 0x224   : > { %v2491_v15 = vmul.f32 0.2, %v2363_v26  ;;  %v2492_v35 = vmul.f32 0.2, %v2364_v18  ;;  %3193 = vmatmul.msk.f32.gmra.mxu2 %vm380_vm0, %v3281_v21  ;;  %3197 = vmatmul.msk.f32.gmra.mxu3 %vm380_vm0, %v3281_v21 }
 0x225   : > { %v2521_v30 = vmul.f32 0.2, %v2393_v19  ;;  %v2522_v31 = vmul.f32 0.2, %v2394_v20 }
 0x226   : > { %v2619_v50 = vmax.f32 %v2363_v26, %v2491_v15  ;;  %v2620_v57 = vmax.f32 %v2364_v18, %v2492_v35  ;;  %v4998_v15 = vld [vmem:[#allocation41_spill] sm:$0xff] }
 0x227   : > { %v2649_v4 = vmax.f32 %v2393_v19, %v2521_v30  ;;  %v2650_v46 = vmax.f32 %v2394_v20, %v2522_v31  ;;  %v1765_v47 = vpop.f32.mrf.mxu2  ;;  %v1794_v48 = vpop.f32.mrf.mxu3  ;;  %v4997_v20 = vld [vmem:[#allocation40_spill] sm:$0xff] }
 0x228   : > { %2747 = vst [vmem:[%s4324_s13 + $0x270] sm:$0xff] %v2619_v50  ;;  %v1766_v7 = vadd.f32 %v1765_v47, %v4989_v49  ;;  %v1795_v8 = vadd.f32 %v1794_v48, %v4990_v56  ;;  %v1814_v2 = vpop.f32.mrf.mxu0  ;;  %v1843_v3 = vpop.f32.mrf.mxu1  ;;  %v4999_v50 = vld [vmem:[#allocation42_spill] sm:$0xff] }
 0x229   : > { %2748 = vst [vmem:[%s4324_s13 + $0x278] sm:$0xff] %v2620_v57  ;;  %v1815_v6 = vadd.f32 %v1814_v2, %v4991_v5  ;;  %v1844_v22 = vadd.f32 %v1843_v3, %v4992_v37 }
 0x22a   : > { %2777 = vst [vmem:[%s4324_s13 + $0x360] sm:$0xff] %v2649_v4  ;;  %v2395_v58 = vadd.f32 %v4368_v34, %v1766_v7  ;;  %v2396_v59 = vadd.f32 %v4368_v34, %v1795_v8  ;;  %v5000_v4 = vld [vmem:[#allocation43_spill] sm:$0xff] }
 0x22b   : > { %2778 = vst [vmem:[%s4324_s13 + $0x368] sm:$0xff] %v2650_v46  ;;  %v2301_v60 = vadd.f32 %v4301_v14, %v1815_v6  ;;  %v2302_v61 = vadd.f32 %v4301_v14, %v1844_v22 }
 0x22c   : > { %v2523_v36 = vmul.f32 0.2, %v2395_v58  ;;  %v2524_v51 = vmul.f32 0.2, %v2396_v59 }
 0x22d   : > { %v2429_v28 = vmul.f32 0.2, %v2301_v60  ;;  %v2430_v32 = vmul.f32 0.2, %v2302_v61 }
 0x22e   : > { %v2651_v42 = vmax.f32 %v2395_v58, %v2523_v36  ;;  %v2652_v43 = vmax.f32 %v2396_v59, %v2524_v51  ;;  %v5002_v36 = vld [vmem:[#allocation45_spill] sm:$0xff] }
 0x22f   : > { %v2557_v13 = vmax.f32 %v2301_v60, %v2429_v28  ;;  %v2558_v44 = vmax.f32 %v2302_v61, %v2430_v32  ;;  %v1872_v45 = vpop.f32.mrf.mxu2  ;;  %v1901_v33 = vpop.f32.mrf.mxu3  ;;  %v5001_v60 = vld [vmem:[#allocation44_spill] sm:$0xff] }
 0x230   : > { %2779 = vst [vmem:[%s4324_s13 + $0x370] sm:$0xff] %v2651_v42  ;;  %v1873_v9 = vadd.f32 %v1872_v45, %v4993_v38  ;;  %v1902_v17 = vadd.f32 %v1901_v33, %v4994_v10  ;;  %v1817_v11 = vpop.f32.mrf.mxu0  ;;  %v1846_v12 = vpop.f32.mrf.mxu1  ;;  %v5003_v42 = vld [vmem:[#allocation46_spill] sm:$0xff] }
 0x231   : > { %2780 = vst [vmem:[%s4324_s13 + $0x378] sm:$0xff] %v2652_v43  ;;  %v1818_v40 = vadd.f32 %v1817_v11, %v4995_v39  ;;  %v1847_v52 = vadd.f32 %v1846_v12, %v4996_v41 }
 0x232   : > { %2685 = vst [vmem:[%s4324_s13 + $0x80] sm:$0xff] %v2557_v13  ;;  %v2303_v53 = vadd.f32 %v4301_v14, %v1873_v9  ;;  %v2304_v54 = vadd.f32 %v4301_v14, %v1902_v17  ;;  %v5004_v13 = vld [vmem:[#allocation47_spill] sm:$0xff] }
 0x233   : > { %2686 = vst [vmem:[%s4324_s13 + $0x88] sm:$0xff] %v2558_v44  ;;  %v2333_v55 = vadd.f32 %v4320_v29, %v1818_v40  ;;  %v2334_v23 = vadd.f32 %v4320_v29, %v1847_v52 }
 0x234   : > { %v2431_v62 = vmul.f32 0.2, %v2303_v53  ;;  %v2432_v63 = vmul.f32 0.2, %v2304_v54 }
 0x235   : > { %v2461_v0 = vmul.f32 0.2, %v2333_v55  ;;  %v2462_v16 = vmul.f32 0.2, %v2334_v23 }
 0x236   : > { %v2559_v1 = vmax.f32 %v2303_v53, %v2431_v62  ;;  %v2560_v24 = vmax.f32 %v2304_v54, %v2432_v63  ;;  %v5006_v62 = vld [vmem:[#allocation49_spill] sm:$0xff] }
 0x237   : > { %v2589_v25 = vmax.f32 %v2333_v55, %v2461_v0  ;;  %v2590_v26 = vmax.f32 %v2334_v23, %v2462_v16  ;;  %v1875_v18 = vpop.f32.mrf.mxu2  ;;  %v1904_v19 = vpop.f32.mrf.mxu3  ;;  %v5005_v55 = vld [vmem:[#allocation48_spill] sm:$0xff] }
 0x238   : > { %2687 = vst [vmem:[%s4324_s13 + $0x90] sm:$0xff] %v2559_v1  ;;  %v1876_v21 = vadd.f32 %v1875_v18, %v4997_v20  ;;  %v1905_v35 = vadd.f32 %v1904_v19, %v4998_v15  ;;  %v1820_v30 = vpop.f32.mrf.mxu0  ;;  %v1849_v31 = vpop.f32.mrf.mxu1  ;;  %v5007_v1 = vld [vmem:[#allocation50_spill] sm:$0xff] }
 0x239   : > { %2688 = vst [vmem:[%s4324_s13 + $0x98] sm:$0xff] %v2560_v24  ;;  %v1821_v57 = vadd.f32 %v1820_v30, %v4999_v50  ;;  %v1850_v46 = vadd.f32 %v1849_v31, %v5000_v4 }
 0x23a   : > { %2717 = vst [vmem:[%s4324_s13 + $0x180] sm:$0xff] %v2589_v25  ;;  %v2335_v47 = vadd.f32 %v4320_v29, %v1876_v21  ;;  %v2336_v48 = vadd.f32 %v4320_v29, %v1905_v35  ;;  %v5008_v25 = vld [vmem:[#allocation51_spill] sm:$0xff] }
 0x23b   : > { %2718 = vst [vmem:[%s4324_s13 + $0x188] sm:$0xff] %v2590_v26  ;;  %v2365_v49 = vadd.f32 %v4344_v27, %v1821_v57  ;;  %v2366_v7 = vadd.f32 %v4344_v27, %v1850_v46 }
 0x23c   : > { %v2463_v56 = vmul.f32 0.2, %v2335_v47  ;;  %v2464_v8 = vmul.f32 0.2, %v2336_v48 }
 0x23d   : > { %v2493_v2 = vmul.f32 0.2, %v2365_v49  ;;  %v2494_v3 = vmul.f32 0.2, %v2366_v7 }
 0x23e   : > { %v2591_v5 = vmax.f32 %v2335_v47, %v2463_v56  ;;  %v2592_v6 = vmax.f32 %v2336_v48, %v2464_v8  ;;  %v5010_v56 = vld [vmem:[#allocation53_spill] sm:$0xff] }
 0x23f   : > { %v2621_v37 = vmax.f32 %v2365_v49, %v2493_v2  ;;  %v2622_v22 = vmax.f32 %v2366_v7, %v2494_v3  ;;  %v1878_v58 = vpop.f32.mrf.mxu2  ;;  %v1907_v59 = vpop.f32.mrf.mxu3  ;;  %v5009_v49 = vld [vmem:[#allocation52_spill] sm:$0xff] }
 0x240   : > { %2719 = vst [vmem:[%s4324_s13 + $0x190] sm:$0xff] %v2591_v5  ;;  %v1879_v61 = vadd.f32 %v1878_v58, %v5001_v60  ;;  %v1908_v51 = vadd.f32 %v1907_v59, %v5002_v36  ;;  %v1823_v28 = vpop.f32.mrf.mxu0  ;;  %v1852_v32 = vpop.f32.mrf.mxu1  ;;  %v5011_v5 = vld [vmem:[#allocation54_spill] sm:$0xff] }
 0x241   : > { %2720 = vst [vmem:[%s4324_s13 + $0x198] sm:$0xff] %v2592_v6  ;;  %v1824_v43 = vadd.f32 %v1823_v28, %v5003_v42  ;;  %v1853_v44 = vadd.f32 %v1852_v32, %v5004_v13 }
 0x242   : > { %2749 = vst [vmem:[%s4324_s13 + $0x280] sm:$0xff] %v2621_v37  ;;  %v2367_v45 = vadd.f32 %v4344_v27, %v1879_v61  ;;  %v2368_v33 = vadd.f32 %v4344_v27, %v1908_v51  ;;  %v5012_v37 = vld [vmem:[#allocation55_spill] sm:$0xff] }
 0x243   : > { %2750 = vst [vmem:[%s4324_s13 + $0x288] sm:$0xff] %v2622_v22  ;;  %v2397_v38 = vadd.f32 %v4368_v34, %v1824_v43  ;;  %v2398_v9 = vadd.f32 %v4368_v34, %v1853_v44 }
 0x244   : > { %v2495_v10 = vmul.f32 0.2, %v2367_v45  ;;  %v2496_v17 = vmul.f32 0.2, %v2368_v33 }
 0x245   : > { %v2525_v11 = vmul.f32 0.2, %v2397_v38  ;;  %v2526_v12 = vmul.f32 0.2, %v2398_v9 }
 0x246   : > { %v2623_v39 = vmax.f32 %v2367_v45, %v2495_v10  ;;  %v2624_v40 = vmax.f32 %v2368_v33, %v2496_v17  ;;  %v5014_v10 = vld [vmem:[#allocation57_spill] sm:$0xff] }
 0x247   : > { %v2653_v41 = vmax.f32 %v2397_v38, %v2525_v11  ;;  %v2654_v52 = vmax.f32 %v2398_v9, %v2526_v12  ;;  %v1881_v53 = vpop.f32.mrf.mxu2  ;;  %v1910_v54 = vpop.f32.mrf.mxu3  ;;  %v5013_v38 = vld [vmem:[#allocation56_spill] sm:$0xff] }
 0x248   : > { %2751 = vst [vmem:[%s4324_s13 + $0x290] sm:$0xff] %v2623_v39  ;;  %v1882_v23 = vadd.f32 %v1881_v53, %v5005_v55  ;;  %v1911_v63 = vadd.f32 %v1910_v54, %v5006_v62  ;;  %v1930_v0 = vpop.f32.mrf.mxu0  ;;  %v1959_v16 = vpop.f32.mrf.mxu1  ;;  %v5015_v39 = vld [vmem:[#allocation58_spill] sm:$0xff] }
 0x249   : > { %2752 = vst [vmem:[%s4324_s13 + $0x298] sm:$0xff] %v2624_v40  ;;  %v1931_v24 = vadd.f32 %v1930_v0, %v5007_v1  ;;  %v1960_v26 = vadd.f32 %v1959_v16, %v5008_v25 }
 0x24a   : > { %2781 = vst [vmem:[%s4324_s13 + $0x380] sm:$0xff] %v2653_v41  ;;  %v2399_v18 = vadd.f32 %v4368_v34, %v1882_v23  ;;  %v2400_v19 = vadd.f32 %v4368_v34, %v1911_v63  ;;  %v5016_v41 = vld [vmem:[#allocation59_spill] sm:$0xff] }
 0x24b   : > { %2782 = vst [vmem:[%s4324_s13 + $0x388] sm:$0xff] %v2654_v52  ;;  %v2305_v20 = vadd.f32 %v4301_v14, %v1931_v24  ;;  %v2306_v21 = vadd.f32 %v4301_v14, %v1960_v26 }
 0x24c   : > { %v2527_v15 = vmul.f32 0.2, %v2399_v18  ;;  %v2528_v35 = vmul.f32 0.2, %v2400_v19 }
 0x24d   : > { %v2433_v30 = vmul.f32 0.2, %v2305_v20  ;;  %v2434_v31 = vmul.f32 0.2, %v2306_v21 }
 0x24e   : > { %v2655_v50 = vmax.f32 %v2399_v18, %v2527_v15  ;;  %v2656_v57 = vmax.f32 %v2400_v19, %v2528_v35  ;;  %v5018_v15 = vld [vmem:[#allocation61_spill] sm:$0xff] }
 0x24f   : > { %v2561_v4 = vmax.f32 %v2305_v20, %v2433_v30  ;;  %v2562_v46 = vmax.f32 %v2306_v21, %v2434_v31  ;;  %v1988_v47 = vpop.f32.mrf.mxu2  ;;  %v2017_v48 = vpop.f32.mrf.mxu3  ;;  %v5017_v20 = vld [vmem:[#allocation60_spill] sm:$0xff] }
 0x250   : > { %2783 = vst [vmem:[%s4324_s13 + $0x390] sm:$0xff] %v2655_v50  ;;  %v1989_v7 = vadd.f32 %v1988_v47, %v5009_v49  ;;  %v2018_v8 = vadd.f32 %v2017_v48, %v5010_v56  ;;  %v1933_v2 = vpop.f32.mrf.mxu0  ;;  %v1962_v3 = vpop.f32.mrf.mxu1  ;;  %v5019_v50 = vld [vmem:[#allocation62_spill] sm:$0xff] }
 0x251   : > { %2784 = vst [vmem:[%s4324_s13 + $0x398] sm:$0xff] %v2656_v57  ;;  %v1934_v6 = vadd.f32 %v1933_v2, %v5011_v5  ;;  %v1963_v22 = vadd.f32 %v1962_v3, %v5012_v37 }
 0x252   : > { %2689 = vst [vmem:[%s4324_s13 + $0xa0] sm:$0xff] %v2561_v4  ;;  %v2307_v58 = vadd.f32 %v4301_v14, %v1989_v7  ;;  %v2308_v59 = vadd.f32 %v4301_v14, %v2018_v8  ;;  %v5020_v4 = vld [vmem:[#allocation63_spill] sm:$0xff] }
 0x253   : > { %2690 = vst [vmem:[%s4324_s13 + $0xa8] sm:$0xff] %v2562_v46  ;;  %v2337_v60 = vadd.f32 %v4320_v29, %v1934_v6  ;;  %v2338_v61 = vadd.f32 %v4320_v29, %v1963_v22 }
 0x254   : > { %v2435_v36 = vmul.f32 0.2, %v2307_v58  ;;  %v2436_v51 = vmul.f32 0.2, %v2308_v59 }
 0x255   : > { %v2465_v28 = vmul.f32 0.2, %v2337_v60  ;;  %v2466_v32 = vmul.f32 0.2, %v2338_v61 }
 0x256   : > { %v2563_v42 = vmax.f32 %v2307_v58, %v2435_v36  ;;  %v2564_v43 = vmax.f32 %v2308_v59, %v2436_v51  ;;  %v5022_v36 = vld [vmem:[#allocation65_spill] sm:$0xff] }
 0x257   : > { %v2593_v13 = vmax.f32 %v2337_v60, %v2465_v28  ;;  %v2594_v44 = vmax.f32 %v2338_v61, %v2466_v32  ;;  %v1991_v45 = vpop.f32.mrf.mxu2  ;;  %v2020_v33 = vpop.f32.mrf.mxu3  ;;  %v5021_v60 = vld [vmem:[#allocation64_spill] sm:$0xff] }
 0x258   : > { %2691 = vst [vmem:[%s4324_s13 + $0xb0] sm:$0xff] %v2563_v42  ;;  %v1992_v9 = vadd.f32 %v1991_v45, %v5013_v38  ;;  %v2021_v17 = vadd.f32 %v2020_v33, %v5014_v10  ;;  %v1936_v11 = vpop.f32.mrf.mxu0  ;;  %v1965_v12 = vpop.f32.mrf.mxu1  ;;  %v5023_v42 = vld [vmem:[#allocation66_spill] sm:$0xff] }
 0x259   : > { %2692 = vst [vmem:[%s4324_s13 + $0xb8] sm:$0xff] %v2564_v43  ;;  %v1937_v40 = vadd.f32 %v1936_v11, %v5015_v39  ;;  %v1966_v52 = vadd.f32 %v1965_v12, %v5016_v41 }
 0x25a   : > { %2721 = vst [vmem:[%s4324_s13 + $0x1a0] sm:$0xff] %v2593_v13  ;;  %v2339_v53 = vadd.f32 %v4320_v29, %v1992_v9  ;;  %v2340_v54 = vadd.f32 %v4320_v29, %v2021_v17  ;;  %v5024_v13 = vld [vmem:[#allocation67_spill] sm:$0xff] }
 0x25b   : > { %2722 = vst [vmem:[%s4324_s13 + $0x1a8] sm:$0xff] %v2594_v44  ;;  %v2369_v55 = vadd.f32 %v4344_v27, %v1937_v40  ;;  %v2370_v23 = vadd.f32 %v4344_v27, %v1966_v52 }
 0x25c   : > { %v2467_v62 = vmul.f32 0.2, %v2339_v53  ;;  %v2468_v63 = vmul.f32 0.2, %v2340_v54 }
 0x25d   : > { %v2497_v0 = vmul.f32 0.2, %v2369_v55  ;;  %v2498_v16 = vmul.f32 0.2, %v2370_v23 }
 0x25e   : > { %v2595_v1 = vmax.f32 %v2339_v53, %v2467_v62  ;;  %v2596_v24 = vmax.f32 %v2340_v54, %v2468_v63  ;;  %v5026_v62 = vld [vmem:[#allocation69_spill] sm:$0xff] }
 0x25f   : > { %v2625_v25 = vmax.f32 %v2369_v55, %v2497_v0  ;;  %v2626_v26 = vmax.f32 %v2370_v23, %v2498_v16  ;;  %v1994_v18 = vpop.f32.mrf.mxu2  ;;  %v2023_v19 = vpop.f32.mrf.mxu3  ;;  %v5025_v55 = vld [vmem:[#allocation68_spill] sm:$0xff] }
 0x260   : > { %2723 = vst [vmem:[%s4324_s13 + $0x1b0] sm:$0xff] %v2595_v1  ;;  %v1995_v21 = vadd.f32 %v1994_v18, %v5017_v20  ;;  %v2024_v35 = vadd.f32 %v2023_v19, %v5018_v15  ;;  %v1939_v30 = vpop.f32.mrf.mxu0  ;;  %v1968_v31 = vpop.f32.mrf.mxu1  ;;  %v5027_v1 = vld [vmem:[#allocation70_spill] sm:$0xff] }
 0x261   : > { %2724 = vst [vmem:[%s4324_s13 + $0x1b8] sm:$0xff] %v2596_v24  ;;  %v1940_v57 = vadd.f32 %v1939_v30, %v5019_v50  ;;  %v1969_v46 = vadd.f32 %v1968_v31, %v5020_v4 }
 0x262   : > { %2753 = vst [vmem:[%s4324_s13 + $0x2a0] sm:$0xff] %v2625_v25  ;;  %v2371_v47 = vadd.f32 %v4344_v27, %v1995_v21  ;;  %v2372_v48 = vadd.f32 %v4344_v27, %v2024_v35  ;;  %v5028_v25 = vld [vmem:[#allocation71_spill] sm:$0xff] }
 0x263   : > { %2754 = vst [vmem:[%s4324_s13 + $0x2a8] sm:$0xff] %v2626_v26  ;;  %v2401_v49 = vadd.f32 %v4368_v34, %v1940_v57  ;;  %v2402_v7 = vadd.f32 %v4368_v34, %v1969_v46 }
 0x264   : > { %v2499_v56 = vmul.f32 0.2, %v2371_v47  ;;  %v2500_v8 = vmul.f32 0.2, %v2372_v48 }
 0x265   : > { %v2529_v2 = vmul.f32 0.2, %v2401_v49  ;;  %v2530_v3 = vmul.f32 0.2, %v2402_v7 }
 0x266   : > { %v2627_v5 = vmax.f32 %v2371_v47, %v2499_v56  ;;  %v2628_v6 = vmax.f32 %v2372_v48, %v2500_v8  ;;  %v5030_v56 = vld [vmem:[#allocation73_spill] sm:$0xff] }
 0x267   : > { %v2657_v37 = vmax.f32 %v2401_v49, %v2529_v2  ;;  %v2658_v22 = vmax.f32 %v2402_v7, %v2530_v3  ;;  %v1997_v58 = vpop.f32.mrf.mxu2  ;;  %v2026_v59 = vpop.f32.mrf.mxu3  ;;  %v5029_v49 = vld [vmem:[#allocation72_spill] sm:$0xff] }
 0x268   : > { %2755 = vst [vmem:[%s4324_s13 + $0x2b0] sm:$0xff] %v2627_v5  ;;  %v1998_v61 = vadd.f32 %v1997_v58, %v5021_v60  ;;  %v2027_v51 = vadd.f32 %v2026_v59, %v5022_v36  ;;  %v2046_v28 = vpop.f32.mrf.mxu0  ;;  %v2075_v32 = vpop.f32.mrf.mxu1  ;;  %v5031_v5 = vld [vmem:[#allocation74_spill] sm:$0xff] }
 0x269   : > { %2756 = vst [vmem:[%s4324_s13 + $0x2b8] sm:$0xff] %v2628_v6  ;;  %v2047_v43 = vadd.f32 %v2046_v28, %v5023_v42  ;;  %v2076_v44 = vadd.f32 %v2075_v32, %v5024_v13 }
 0x26a   : > { %2785 = vst [vmem:[%s4324_s13 + $0x3a0] sm:$0xff] %v2657_v37  ;;  %v2403_v45 = vadd.f32 %v4368_v34, %v1998_v61  ;;  %v2404_v33 = vadd.f32 %v4368_v34, %v2027_v51  ;;  %v5032_v37 = vld [vmem:[#allocation75_spill] sm:$0xff] }
 0x26b   : > { %2786 = vst [vmem:[%s4324_s13 + $0x3a8] sm:$0xff] %v2658_v22  ;;  %v2309_v38 = vadd.f32 %v4301_v14, %v2047_v43  ;;  %v2310_v9 = vadd.f32 %v4301_v14, %v2076_v44 }
 0x26c   : > { %v2531_v10 = vmul.f32 0.2, %v2403_v45  ;;  %v2532_v17 = vmul.f32 0.2, %v2404_v33 }
 0x26d   : > { %v2437_v11 = vmul.f32 0.2, %v2309_v38  ;;  %v2438_v12 = vmul.f32 0.2, %v2310_v9 }
 0x26e   : > { %v2659_v39 = vmax.f32 %v2403_v45, %v2531_v10  ;;  %v2660_v40 = vmax.f32 %v2404_v33, %v2532_v17  ;;  %v5034_v10 = vld [vmem:[#allocation77_spill] sm:$0xff] }
 0x26f   : > { %v2565_v41 = vmax.f32 %v2309_v38, %v2437_v11  ;;  %v2566_v52 = vmax.f32 %v2310_v9, %v2438_v12  ;;  %v2104_v53 = vpop.f32.mrf.mxu2  ;;  %v2133_v54 = vpop.f32.mrf.mxu3  ;;  %v5033_v38 = vld [vmem:[#allocation76_spill] sm:$0xff] }
 0x270   : > { %2787 = vst [vmem:[%s4324_s13 + $0x3b0] sm:$0xff] %v2659_v39  ;;  %v2105_v23 = vadd.f32 %v2104_v53, %v5025_v55  ;;  %v2134_v63 = vadd.f32 %v2133_v54, %v5026_v62  ;;  %v2049_v0 = vpop.f32.mrf.mxu0  ;;  %v2078_v16 = vpop.f32.mrf.mxu1  ;;  %v5035_v39 = vld [vmem:[#allocation78_spill] sm:$0xff] }
 0x271   : > { %2788 = vst [vmem:[%s4324_s13 + $0x3b8] sm:$0xff] %v2660_v40  ;;  %v2050_v24 = vadd.f32 %v2049_v0, %v5027_v1  ;;  %v2079_v26 = vadd.f32 %v2078_v16, %v5028_v25 }
 0x272   : > { %2693 = vst [vmem:[%s4324_s13 + $0xc0] sm:$0xff] %v2565_v41  ;;  %v2311_v18 = vadd.f32 %v4301_v14, %v2105_v23  ;;  %v2312_v19 = vadd.f32 %v4301_v14, %v2134_v63  ;;  %v5036_v41 = vld [vmem:[#allocation79_spill] sm:$0xff] }
 0x273   : > { %2694 = vst [vmem:[%s4324_s13 + $0xc8] sm:$0xff] %v2566_v52  ;;  %v2341_v20 = vadd.f32 %v4320_v29, %v2050_v24  ;;  %v2342_v21 = vadd.f32 %v4320_v29, %v2079_v26 }
 0x274   : > { %v2439_v15 = vmul.f32 0.2, %v2311_v18  ;;  %v2440_v35 = vmul.f32 0.2, %v2312_v19 }
 0x275   : > { %v2469_v30 = vmul.f32 0.2, %v2341_v20  ;;  %v2470_v31 = vmul.f32 0.2, %v2342_v21 }
 0x276   : > { %v2567_v50 = vmax.f32 %v2311_v18, %v2439_v15  ;;  %v2568_v57 = vmax.f32 %v2312_v19, %v2440_v35  ;;  %v5038_v15 = vld [vmem:[#allocation81_spill] sm:$0xff] }
 0x277   : > { %v2597_v4 = vmax.f32 %v2341_v20, %v2469_v30  ;;  %v2598_v46 = vmax.f32 %v2342_v21, %v2470_v31  ;;  %v2107_v47 = vpop.f32.mrf.mxu2  ;;  %v2136_v48 = vpop.f32.mrf.mxu3  ;;  %v5037_v20 = vld [vmem:[#allocation80_spill] sm:$0xff] }
 0x278   : > { %2695 = vst [vmem:[%s4324_s13 + $0xd0] sm:$0xff] %v2567_v50  ;;  %v2108_v7 = vadd.f32 %v2107_v47, %v5029_v49  ;;  %v2137_v8 = vadd.f32 %v2136_v48, %v5030_v56  ;;  %v2052_v2 = vpop.f32.mrf.mxu0  ;;  %v2081_v3 = vpop.f32.mrf.mxu1  ;;  %v5039_v50 = vld [vmem:[#allocation82_spill] sm:$0xff] }
 0x279   : > { %2696 = vst [vmem:[%s4324_s13 + $0xd8] sm:$0xff] %v2568_v57  ;;  %v2053_v6 = vadd.f32 %v2052_v2, %v5031_v5  ;;  %v2082_v22 = vadd.f32 %v2081_v3, %v5032_v37 }
 0x27a   : > { %2725 = vst [vmem:[%s4324_s13 + $0x1c0] sm:$0xff] %v2597_v4  ;;  %v2343_v58 = vadd.f32 %v4320_v29, %v2108_v7  ;;  %v2344_v59 = vadd.f32 %v4320_v29, %v2137_v8  ;;  %v5040_v4 = vld [vmem:[#allocation83_spill] sm:$0xff] }
 0x27b   : > { %2726 = vst [vmem:[%s4324_s13 + $0x1c8] sm:$0xff] %v2598_v46  ;;  %v2373_v60 = vadd.f32 %v4344_v27, %v2053_v6  ;;  %v2374_v61 = vadd.f32 %v4344_v27, %v2082_v22 }
 0x27c   : > { %v2471_v36 = vmul.f32 0.2, %v2343_v58  ;;  %v2472_v51 = vmul.f32 0.2, %v2344_v59 }
 0x27d   : > { %v2501_v28 = vmul.f32 0.2, %v2373_v60  ;;  %v2502_v32 = vmul.f32 0.2, %v2374_v61 }
 0x27e   : > { %v2599_v42 = vmax.f32 %v2343_v58, %v2471_v36  ;;  %v2600_v43 = vmax.f32 %v2344_v59, %v2472_v51  ;;  %v5042_v36 = vld [vmem:[#allocation85_spill] sm:$0xff] }
 0x27f   : > { %v2629_v13 = vmax.f32 %v2373_v60, %v2501_v28  ;;  %v2630_v44 = vmax.f32 %v2374_v61, %v2502_v32  ;;  %v2110_v45 = vpop.f32.mrf.mxu2  ;;  %v2139_v33 = vpop.f32.mrf.mxu3  ;;  %v5041_v60 = vld [vmem:[#allocation84_spill] sm:$0xff] }
 0x280   : > { %2727 = vst [vmem:[%s4324_s13 + $0x1d0] sm:$0xff] %v2599_v42  ;;  %v2111_v9 = vadd.f32 %v2110_v45, %v5033_v38  ;;  %v2140_v17 = vadd.f32 %v2139_v33, %v5034_v10  ;;  %v2055_v11 = vpop.f32.mrf.mxu0  ;;  %v2084_v12 = vpop.f32.mrf.mxu1  ;;  %v5043_v42 = vld [vmem:[#allocation86_spill] sm:$0xff] }
 0x281   : > { %2728 = vst [vmem:[%s4324_s13 + $0x1d8] sm:$0xff] %v2600_v43  ;;  %v2056_v40 = vadd.f32 %v2055_v11, %v5035_v39  ;;  %v2085_v52 = vadd.f32 %v2084_v12, %v5036_v41 }
 0x282   : > { %2757 = vst [vmem:[%s4324_s13 + $0x2c0] sm:$0xff] %v2629_v13  ;;  %v2375_v53 = vadd.f32 %v4344_v27, %v2111_v9  ;;  %v2376_v54 = vadd.f32 %v4344_v27, %v2140_v17  ;;  %v5044_v13 = vld [vmem:[#allocation87_spill] sm:$0xff] }
 0x283   : > { %2758 = vst [vmem:[%s4324_s13 + $0x2c8] sm:$0xff] %v2630_v44  ;;  %v2405_v55 = vadd.f32 %v4368_v34, %v2056_v40  ;;  %v2406_v23 = vadd.f32 %v4368_v34, %v2085_v52 }
 0x284   : > { %v2503_v62 = vmul.f32 0.2, %v2375_v53  ;;  %v2504_v63 = vmul.f32 0.2, %v2376_v54 }
 0x285   : > { %v2533_v0 = vmul.f32 0.2, %v2405_v55  ;;  %v2534_v16 = vmul.f32 0.2, %v2406_v23 }
 0x286   : > { %v2631_v1 = vmax.f32 %v2375_v53, %v2503_v62  ;;  %v2632_v24 = vmax.f32 %v2376_v54, %v2504_v63 }
 0x287   : > { %v2661_v25 = vmax.f32 %v2405_v55, %v2533_v0  ;;  %v2662_v26 = vmax.f32 %v2406_v23, %v2534_v16  ;;  %v2113_v18 = vpop.f32.mrf.mxu2  ;;  %v2142_v19 = vpop.f32.mrf.mxu3  ;;  %v5046_v23 = vld [vmem:[#allocation89_spill] sm:$0xff]  ;;  %v5047_v16 = vld [vmem:[#allocation90_spill] sm:$0xff] }
 0x288   : > { %2759 = vst [vmem:[%s4324_s13 + $0x2d0] sm:$0xff] %v2631_v1  ;;  %v2114_v21 = vadd.f32 %v2113_v18, %v5037_v20  ;;  %v2143_v35 = vadd.f32 %v2142_v19, %v5038_v15  ;;  %v2162_v30 = vpop.f32.mrf.mxu0  ;;  %v2191_v31 = vpop.f32.mrf.mxu1 }
 0x289   : > { %2760 = vst [vmem:[%s4324_s13 + $0x2d8] sm:$0xff] %v2632_v24  ;;  %v2163_v57 = vadd.f32 %v2162_v30, %v5039_v50  ;;  %v2192_v46 = vadd.f32 %v2191_v31, %v5040_v4  ;;  %v5048_v24 = vld [vmem:[#allocation91_spill] sm:$0xff] }
 0x28a   : > { %2789 = vst [vmem:[%s4324_s13 + $0x3c0] sm:$0xff] %v2661_v25  ;;  %v2407_v47 = vadd.f32 %v4368_v34, %v2114_v21  ;;  %v2408_v48 = vadd.f32 %v4368_v34, %v2143_v35 }
 0x28b   : > { %2790 = vst [vmem:[%s4324_s13 + $0x3c8] sm:$0xff] %v2662_v26  ;;  %v2313_v49 = vadd.f32 %v4301_v14, %v2163_v57  ;;  %v2314_v7 = vadd.f32 %v4301_v14, %v2192_v46 }
 0x28c   : > { %v2535_v56 = vmul.f32 0.2, %v2407_v47  ;;  %v2536_v8 = vmul.f32 0.2, %v2408_v48 }
 0x28d   : > { %v2441_v2 = vmul.f32 0.2, %v2313_v49  ;;  %v2442_v3 = vmul.f32 0.2, %v2314_v7 }
 0x28e   : > { %v2663_v5 = vmax.f32 %v2407_v47, %v2535_v56  ;;  %v2664_v6 = vmax.f32 %v2408_v48, %v2536_v8 }
 0x28f   : > { %v2569_v37 = vmax.f32 %v2313_v49, %v2441_v2  ;;  %v2570_v22 = vmax.f32 %v2314_v7, %v2442_v3  ;;  %v2220_v58 = vpop.f32.mrf.mxu2  ;;  %v2249_v59 = vpop.f32.mrf.mxu3  ;;  %v5050_v49 = vld [vmem:[#allocation93_spill] sm:$0xff]  ;;  %v5051_v2 = vld [vmem:[#allocation94_spill] sm:$0xff] }
 0x290   : > { %2791 = vst [vmem:[%s4324_s13 + $0x3d0] sm:$0xff] %v2663_v5  ;;  %v2221_v61 = vadd.f32 %v2220_v58, %v5041_v60  ;;  %v2250_v51 = vadd.f32 %v2249_v59, %v5042_v36  ;;  %v2165_v28 = vpop.f32.mrf.mxu0  ;;  %v2194_v32 = vpop.f32.mrf.mxu1  ;;  %v5052_v5 = vld [vmem:[#allocation95_spill] sm:$0xff] }
 0x291   : > { %2792 = vst [vmem:[%s4324_s13 + $0x3d8] sm:$0xff] %v2664_v6  ;;  %v2166_v43 = vadd.f32 %v2165_v28, %v5043_v42  ;;  %v2195_v44 = vadd.f32 %v2194_v32, %v5044_v13 }
 0x292   : > { %2697 = vst [vmem:[%s4324_s13 + $0xe0] sm:$0xff] %v2569_v37  ;;  %v2315_v45 = vadd.f32 %v4301_v14, %v2221_v61  ;;  %v2316_v33 = vadd.f32 %v4301_v14, %v2250_v51  ;;  %v5045_v14 = vld [vmem:[#allocation88_spill] sm:$0xff] }
 0x293   : > { %2698 = vst [vmem:[%s4324_s13 + $0xe8] sm:$0xff] %v2570_v22  ;;  %v2345_v38 = vadd.f32 %v4320_v29, %v2166_v43  ;;  %v2346_v9 = vadd.f32 %v4320_v29, %v2195_v44  ;;  %v5053_v44 = vld [vmem:[#allocation96_spill] sm:$0xff] }
 0x294   : > { %v2443_v10 = vmul.f32 0.2, %v2315_v45  ;;  %v2444_v17 = vmul.f32 0.2, %v2316_v33 }
 0x295   : > { %v2473_v11 = vmul.f32 0.2, %v2345_v38  ;;  %v2474_v12 = vmul.f32 0.2, %v2346_v9 }
 0x296   : > { %v2571_v39 = vmax.f32 %v2315_v45, %v2443_v10  ;;  %v2572_v40 = vmax.f32 %v2316_v33, %v2444_v17  ;;  %v5054_v33 = vld [vmem:[#allocation97_spill] sm:$0xff] }
 0x297   : > { %v2601_v41 = vmax.f32 %v2345_v38, %v2473_v11  ;;  %v2602_v52 = vmax.f32 %v2346_v9, %v2474_v12  ;;  %v2223_v53 = vpop.f32.mrf.mxu2  ;;  %v2252_v54 = vpop.f32.mrf.mxu3 }
 0x298   : > { %2699 = vst [vmem:[%s4324_s13 + $0xf0] sm:$0xff] %v2571_v39  ;;  %v2224_v55 = vadd.f32 %v2223_v53, %v5045_v14  ;;  %v2253_v62 = vadd.f32 %v2252_v54, %v5046_v23  ;;  %v2168_v63 = vpop.f32.mrf.mxu0  ;;  %v2197_v0 = vpop.f32.mrf.mxu1 }
 0x299   : > { %2700 = vst [vmem:[%s4324_s13 + $0xf8] sm:$0xff] %v2572_v40  ;;  %v2169_v1 = vadd.f32 %v2168_v63, %v5047_v16  ;;  %v2198_v25 = vadd.f32 %v2197_v0, %v5048_v24 }
 0x29a   : > { %2729 = vst [vmem:[%s4324_s13 + $0x1e0] sm:$0xff] %v2601_v41  ;;  %v2347_v26 = vadd.f32 %v4320_v29, %v2224_v55  ;;  %v2348_v18 = vadd.f32 %v4320_v29, %v2253_v62  ;;  %v5049_v29 = vld [vmem:[#allocation92_spill] sm:$0xff] }
 0x29b   : > { %2730 = vst [vmem:[%s4324_s13 + $0x1e8] sm:$0xff] %v2602_v52  ;;  %v2377_v19 = vadd.f32 %v4344_v27, %v2169_v1  ;;  %v2378_v20 = vadd.f32 %v4344_v27, %v2198_v25 }
 0x29c   : > { %v2475_v21 = vmul.f32 0.2, %v2347_v26  ;;  %v2476_v15 = vmul.f32 0.2, %v2348_v18 }
 0x29d   : > { %v2505_v35 = vmul.f32 0.2, %v2377_v19  ;;  %v2506_v30 = vmul.f32 0.2, %v2378_v20 }
 0x29e   : > { %v2603_v31 = vmax.f32 %v2347_v26, %v2475_v21  ;;  %v2604_v50 = vmax.f32 %v2348_v18, %v2476_v15 }
 0x29f   : > { %v2633_v57 = vmax.f32 %v2377_v19, %v2505_v35  ;;  %v2634_v4 = vmax.f32 %v2378_v20, %v2506_v30  ;;  %v2226_v46 = vpop.f32.mrf.mxu2  ;;  %v2255_v47 = vpop.f32.mrf.mxu3 }
 0x2a0   : > { %2731 = vst [vmem:[%s4324_s13 + $0x1f0] sm:$0xff] %v2603_v31  ;;  %v2227_v48 = vadd.f32 %v2226_v46, %v5049_v29  ;;  %v2256_v7 = vadd.f32 %v2255_v47, %v5050_v49  ;;  %v2171_v56 = vpop.f32.mrf.mxu0  ;;  %v2200_v8 = vpop.f32.mrf.mxu1 }
 0x2a1   : > { %2732 = vst [vmem:[%s4324_s13 + $0x1f8] sm:$0xff] %v2604_v50  ;;  %v2172_v3 = vadd.f32 %v2171_v56, %v5051_v2  ;;  %v2201_v6 = vadd.f32 %v2200_v8, %v5052_v5 }
 0x2a2   : > { %2761 = vst [vmem:[%s4324_s13 + $0x2e0] sm:$0xff] %v2633_v57  ;;  %v2379_v37 = vadd.f32 %v4344_v27, %v2227_v48  ;;  %v2380_v22 = vadd.f32 %v4344_v27, %v2256_v7 }
 0x2a3   : > { %2762 = vst [vmem:[%s4324_s13 + $0x2e8] sm:$0xff] %v2634_v4  ;;  %v2409_v58 = vadd.f32 %v4368_v34, %v2172_v3  ;;  %v2410_v59 = vadd.f32 %v4368_v34, %v2201_v6 }
 0x2a4   : > { %v2507_v60 = vmul.f32 0.2, %v2379_v37  ;;  %v2508_v61 = vmul.f32 0.2, %v2380_v22 }
 0x2a5   : > { %v2537_v36 = vmul.f32 0.2, %v2409_v58  ;;  %v2538_v51 = vmul.f32 0.2, %v2410_v59 }
 0x2a6   : > { %v2635_v28 = vmax.f32 %v2379_v37, %v2507_v60  ;;  %v2636_v32 = vmax.f32 %v2380_v22, %v2508_v61 }
 0x2a7   : > { %v2665_v42 = vmax.f32 %v2409_v58, %v2537_v36  ;;  %v2666_v43 = vmax.f32 %v2410_v59, %v2538_v51  ;;  %v2229_v13 = vpop.f32.mrf.mxu2  ;;  %v2258_v27 = vpop.f32.mrf.mxu3 }
 0x2a8   : > { %2763 = vst [vmem:[%s4324_s13 + $0x2f0] sm:$0xff] %v2635_v28  ;;  %v2230_v45 = vadd.f32 %v2229_v13, %v5053_v44  ;;  %v2259_v38 = vadd.f32 %v2258_v27, %v5054_v33 }
 0x2a9   : > { %2764 = vst [vmem:[%s4324_s13 + $0x2f8] sm:$0xff] %v2636_v32 }
 0x2aa   : > { %2793 = vst [vmem:[%s4324_s13 + $0x3e0] sm:$0xff] %v2665_v42  ;;  %v2411_v9 = vadd.f32 %v4368_v34, %v2230_v45  ;;  %v2412_v10 = vadd.f32 %v4368_v34, %v2259_v38 }
 0x2ab   : > { %2794 = vst [vmem:[%s4324_s13 + $0x3e8] sm:$0xff] %v2666_v43 }
 0x2ac   : > { %v2539_v17 = vmul.f32 0.2, %v2411_v9  ;;  %v2540_v11 = vmul.f32 0.2, %v2412_v10 }
 0x2ae   : > { %v2667_v12 = vmax.f32 %v2411_v9, %v2539_v17  ;;  %v2668_v39 = vmax.f32 %v2412_v10, %v2540_v11 }
 0x2b0   : > { %2795 = vst [vmem:[%s4324_s13 + $0x3f0] sm:$0xff] %v2667_v12 }
 0x2b1   : > { %2796 = vst [vmem:[%s4324_s13 + $0x3f8] sm:$0xff] %v2668_v39 }
 0x2b2   : > { %3369 = shalt.err (!%p3366_p13)
}
 0x2b3   : > { %s3431_s28 = smov 4096   ;;  %s3432_s13 = smov 256  }
 0x2b4   : > { %3210 = dma.vmem_to_hbm [thread:$0]  (%p3514_p9), %s2813_s21, 16384, %s2815_s27, %s2798_s29, %s3431_s28, %s3431_s28, %s3432_s13  }
 0x2b5 PF: > { %s2829_s30 = sand.u32 1, %s3408_s18   ;;  %p3220_p0 = pnand %p2931_p12, %p3521_p11 }
 0x2b6   : > { %s2830_s10 = scalar_lea.sflag [#allocation4], %s2829_s30 }
 0x2b7   : > { %p3221_p1 = pneg %p3220_p0 }
 0x2b9   : > { %3403 = dma.done.wait (%p3221_p1), %s2830_s10, 16384  }
 0x2ba   : > { %3405 = vsyncadd (%p3221_p1), %s2830_s10, 4294950912  ;;  %s24_s23 = sadd.s32 1, %s3428_s23   ;;  %s5055_s21 = sld [smem:[#allocation11_spill]] }
 0x2bb   : > { %p21_p2 = scmp.ge.s32.totalorder %s24_s23, 4   ;;  %s5056_s22 = sld [smem:[#allocation12_spill]] }
 0x2bc   : > { %s5057_s18 = smov %s3412_s19  ;;  %s5058_s19 = smov %s3416_s20 }
 0x2bd   : > { %s5059_s20 = smov %s3519_s7  ;;  %23 = sbr.rel (!%p21_p2) target bundleno = 8 (0x8), region = 98 }
 0x2c2   :  { %2836 = vsyncpa [#allocation3], 1 }
 0x2c3   :  { %2838 = vsyncpa [#allocation3 + $0x1], 1 }
 0x2c4   :  { %2839 = vsyncpa [#allocation6], 1 }
 0x2c5   :  { %2841 = vsyncpa [#allocation6 + $0x1], 1 }
 0x2c6   :  { %2842 = vsyncpa [#allocation4], 1 }
 0x2c7   :  { %2844 = vsyncpa [#allocation4 + $0x1], 1 }

</bundles_post_ra>
